<compile_context>
chip_gen: v7x
topology: tpu7x:2x2x1
jax: 0.10.0
libtpu: 0.0.40
codegen_flags: <defaults>
</compile_context>

<pallas_src>
import jax
import jax.numpy as jnp
from jax.experimental import pallas as pl
from jax.experimental.pallas import tpu as pltpu


def _leaky_relu(x, slope=0.2):
    return jnp.where(x >= 0, x, slope * x)


def make_lstm_features_kernel(seq_len, batch, input_size, hidden_size,
                              lstm_layers, num_features, hidden_layers):
    T, B, I, H, L = seq_len, batch, input_size, hidden_size, lstm_layers
    F, NH = num_features, hidden_layers
    GW = 4 * L * H                    # fused gate width (all layers' 4H blocks)

    def kernel(x_ref, hc0_ref, feat_ref, px_ref, rw_ref, mlp_ref, ow_ref,
               out_ref, hcN_ref):
        # ---------------- stacked LSTM as a wavefront over (layer, step) ------
        # Hoisted off the serial chain: layer-0 input projection for ALL T
        # steps in one matmul.  px rows [0:I] hold w_ih_0 expanded to width GW
        # (only layer-0's 4H column block is nonzero), row [I] holds all gate
        # biases, so xproj + b_big line up column-wise with the fused gates.
        xproj = jnp.dot(x_ref[...], px_ref[0:I, :],
                        preferred_element_type=jnp.float32)         # (T*B, GW)
        b_big = px_ref[I:I + 1, :]                                   # (1, GW) f32
        w_big = rw_ref[...]                                          # (L*H, GW) bf16

        hs = [hc0_ref[0, l] for l in range(L)]                       # (B, H) f32
        cs = [hc0_ref[1, l] for l in range(L)]

        # Wavefront w: layer l processes timestep t = w - l.  Every input any
        # active layer needs was produced at wavefront w-1 (or is the initial
        # state), so one fused bf16 matmul per step covers all layers'
        # recurrent matmuls AND the layer>0 input projections.
        for w in range(T + L - 1):
            lhs = jnp.concatenate(hs, axis=1).astype(jnp.bfloat16)   # (B, L*H)
            gates = jnp.dot(lhs, w_big,
                            preferred_element_type=jnp.float32) + b_big
            if w < T:                     # layer 0 active: add its x-projection
                gates = gates + xproj[w * B:(w + 1) * B, :]
            for l in range(L):
                t = w - l
                if 0 <= t < T:            # layer l active this wavefront
                    blk = gates[:, 4 * H * l:4 * H * (l + 1)]        # [i,f,o,g]
                    sig = jax.nn.sigmoid(blk[:, :3 * H])             # i, f, o
                    g_g = jnp.tanh(blk[:, 3 * H:])
                    c_new = sig[:, H:2 * H] * cs[l] + sig[:, :H] * g_g
                    hs[l] = sig[:, 2 * H:3 * H] * jnp.tanh(c_new)
                    cs[l] = c_new

        for l in range(L):
            hcN_ref[0, l] = hs[l]
            hcN_ref[1, l] = cs[l]
        last_h = hs[L - 1]                 # == all_outputs[:, -1, :]

        # ------------- features MLP: fc_in + (Linear, BN(eval), Dropout=id) ---
        feat = feat_ref[...]                                          # (B, F)
        feat = _leaky_relu(
            jnp.dot(feat, mlp_ref[0:F, :], preferred_element_type=jnp.float32)
            + mlp_ref[F:F + 1, :])
        base = F + 1
        for _ in range(NH):
            y = (jnp.dot(feat, mlp_ref[base:base + H, :],
                         preferred_element_type=jnp.float32)
                 + mlp_ref[base + H:base + H + 1, :])
            y = (y * mlp_ref[base + H + 1:base + H + 2, :]
                 + mlp_ref[base + H + 2:base + H + 3, :])             # BN (eval)
            feat = _leaky_relu(y)                                     # Dropout=id
            base += H + 3

        # ------------- fc_out on concat([last_h, feat]) as a split matmul -----
        out = (jnp.dot(last_h, ow_ref[0:H, :], preferred_element_type=jnp.float32)
               + jnp.dot(feat, ow_ref[H:2 * H, :],
                         preferred_element_type=jnp.float32)
               + ow_ref[2 * H:2 * H + 1, :])
        out_ref[...] = out

    return kernel


def _permute_gates(a, H):
    """PyTorch LSTM gate column order [i, f, g, o] -> kernel order [i, f, o, g]."""
    return jnp.concatenate([a[..., :2 * H], a[..., 3 * H:4 * H], a[..., 2 * H:3 * H]],
                           axis=-1)


def lstm_features_forward(params, x, h0, c0, features):
    B, T, I = x.shape
    L, _, H = h0.shape
    F = features.shape[1]
    C = params["w_out"].shape[1]
    NH = len(params["hidden"])
    GW = 4 * L * H

    # ---- pack everything into a handful of slabs (few DMAs, not ~25 tiny) ----
    x_flat = jnp.transpose(x, (1, 0, 2)).reshape(T * B, I)     # time-major rows

    # f32 slab: expanded layer-0 input-projection matrix + all gate biases.
    px = jnp.zeros((I + 1, GW), jnp.float32)
    px = px.at[0:I, 0:4 * H].set(_permute_gates(params["lstm"][0]["w_ih_t"], H))
    b_big = jnp.concatenate(
        [_permute_gates(params["lstm"][l]["b"], H) for l in range(L)], axis=1)
    px = px.at[I, :].set(b_big[0])

    # bf16 slab: fused banded block matrix for the per-wavefront matmul.
    #   column block l (width 4H): rows [l*H:(l+1)*H]    = w_hh_l
    #                              rows [(l-1)*H:l*H]    = w_ih_l  (l >= 1)
    rw = jnp.zeros((L * H, GW), jnp.float32)
    for l in range(L):
        rw = rw.at[l * H:(l + 1) * H, 4 * H * l:4 * H * (l + 1)].set(
            _permute_gates(params["lstm"][l]["w_hh_t"], H))
        if l > 0:
            rw = rw.at[(l - 1) * H:l * H, 4 * H * l:4 * H * (l + 1)].set(
                _permute_gates(params["lstm"][l]["w_ih_t"], H))
    rw = rw.astype(jnp.bfloat16)

    hc0 = jnp.stack([h0, c0])                                   # (2, L, B, H)

    mlp_rows = [params["w_in"], params["b_in"]]
    for hl in params["hidden"]:
        mlp_rows += [hl["w"], hl["b"], hl["bn_scale"], hl["bn_shift"]]
    mlp_slab = jnp.concatenate(mlp_rows, axis=0)                # (F+1+NH*(H+3), H)

    ow_slab = jnp.concatenate([params["w_out"], params["b_out"]], axis=0)  # (2H+1, C)

    kernel = make_lstm_features_kernel(T, B, I, H, L, F, NH)
    vmem = pl.BlockSpec(memory_space=pltpu.MemorySpace.VMEM)

    out, hcN = pl.pallas_call(
        kernel,
        out_shape=(
            jax.ShapeDtypeStruct((B, C), jnp.float32),
            jax.ShapeDtypeStruct((2, L, B, H), jnp.float32),
        ),
        in_specs=[vmem] * 7,
        out_specs=(vmem, vmem),
    )(x_flat, hc0, features, px, rw, mlp_slab, ow_slab)
    return out, (hcN[0], hcN[1])


# ---------------------------- pure-JAX reference ---------------------------------
def reference_forward(params, x, h0, c0, features, slope=0.2):
    B, T, I = x.shape
    L, _, H = h0.shape
    layer_in = x
    hs, cs = [], []
    for l in range(L):
        lw = params["lstm"][l]
        h, c = h0[l], c0[l]
        outs = []
        for t in range(T):
            g = layer_in[:, t, :] @ lw["w_ih_t"] + h @ lw["w_hh_t"] + lw["b"]
            i_g = jax.nn.sigmoid(g[:, :H])
            f_g = jax.nn.sigmoid(g[:, H:2 * H])
            g_g = jnp.tanh(g[:, 2 * H:3 * H])
            o_g = jax.nn.sigmoid(g[:, 3 * H:])
            c = f_g * c + i_g * g_g
            h = o_g * jnp.tanh(c)
            outs.append(h)
        layer_in = jnp.stack(outs, axis=1)
        hs.append(h)
        cs.append(c)
    lr = lambda v: jnp.where(v >= 0, v, slope * v)
    feat = lr(features @ params["w_in"] + params["b_in"])
    for hl in params["hidden"]:
        y = feat @ hl["w"] + hl["b"]
        y = y * hl["bn_scale"] + hl["bn_shift"]
        feat = lr(y)
    cat = jnp.concatenate([layer_in[:, -1, :], feat], axis=1)
    out = cat @ params["w_out"] + params["b_out"]
    return out, (jnp.stack(hs), jnp.stack(cs))


# ---------------------------- deterministic param init ---------------------------
def init_params(key, I, H, L, C, F, NH):
    ks = iter(jax.random.split(key, 3 * L + 2 + 6 * NH + 2 + 8))

    def nrm(shape, scale=0.1):
        return scale * jax.random.normal(next(ks), shape, jnp.float32)

    lstm = []
    for l in range(L):
        in_l = I if l == 0 else H
        lstm.append({
            "w_ih_t": nrm((in_l, 4 * H)),
            "w_hh_t": nrm((H, 4 * H)),
            "b": nrm((1, 4 * H)),            # combined b_ih + b_hh
        })
    w_in, b_in = nrm((F, H)), nrm((1, H))
    hidden = []
    eps = 1e-5
    for _ in range(NH):
        w, b = nrm((H, H)), nrm((1, H))
        gamma = 1.0 + nrm((1, H), 0.05)
        beta = nrm((1, H), 0.05)
        rmean = nrm((1, H), 0.05)
        rvar = 1.0 + jnp.abs(nrm((1, H), 0.05))
        scale = gamma / jnp.sqrt(rvar + eps)
        shift = beta - rmean * scale
        hidden.append({"w": w, "b": b, "bn_scale": scale, "bn_shift": shift})
    w_out, b_out = nrm((2 * H, C)), nrm((1, C))
    return {"lstm": lstm, "w_in": w_in, "b_in": b_in, "hidden": hidden,
            "w_out": w_out, "b_out": b_out}


if __name__ == "__main__":
    B, T = 2, 8                      # batch, sequence length
    I, H = 16, 32                    # input_size, hidden_size
    L, C = 2, 10                     # lstm_layers, num_classes
    F, NH = 12, 2                    # num_features, hidden_layers

    key = jax.random.PRNGKey(0)
    k_param, k_x, k_f = jax.random.split(key, 3)

    params = init_params(k_param, I, H, L, C, F, NH)
    x = jax.random.normal(k_x, (B, T, I), jnp.float32)
    features = jax.random.normal(k_f, (B, F), jnp.float32)
    h0 = jnp.zeros((L, B, H), jnp.float32)   # init_hidden()
    c0 = jnp.zeros((L, B, H), jnp.float32)

    out, (hN, cN) = lstm_features_forward(params, x, h0, c0, features)
    jax.block_until_ready((out, hN, cN))

    ref_out, (ref_h, ref_c) = reference_forward(params, x, h0, c0, features)
    assert out.shape == (B, C) and hN.shape == (L, B, H) and cN.shape == (L, B, H)
    # Tolerance slightly relaxed vs v1: the fused recurrent matmul uses bf16
    # MXU operands (everything else stays f32).
    assert jnp.allclose(out, ref_out, atol=5e-3, rtol=5e-3)
    assert jnp.allclose(hN, ref_h, atol=5e-3, rtol=5e-3)
    assert jnp.allclose(cN, ref_c, atol=5e-3, rtol=5e-3)

    print("KERNEL_OK")
</pallas_src>

<mosaic_0001>
module attributes {stable_mosaic.version = 11 : i64} {
  func.func @kernel(%arg0: memref<16x16xf32, #tpu.memory_space<vmem>>, %arg1: memref<2x2x2x32xf32, #tpu.memory_space<vmem>>, %arg2: memref<2x12xf32, #tpu.memory_space<vmem>>, %arg3: memref<17x256xf32, #tpu.memory_space<vmem>>, %arg4: memref<64x256xbf16, #tpu.memory_space<vmem>>, %arg5: memref<83x32xf32, #tpu.memory_space<vmem>>, %arg6: memref<65x10xf32, #tpu.memory_space<vmem>>, %arg7: memref<2x10xf32, #tpu.memory_space<vmem>>, %arg8: memref<2x2x2x32xf32, #tpu.memory_space<vmem>>) attributes {dimension_semantics = [], scalar_prefetch = 0 : i64, scratch_operands = 0 : i64, tpu.core_type = #tpu.core_type<tc>} {
    %c0 = arith.constant 0 : index
    %c0_0 = arith.constant 0 : index
    %0 = vector.load %arg0[%c0, %c0_0] : memref<16x16xf32, #tpu.memory_space<vmem>>, vector<16x16xf32>
    %c0_1 = arith.constant 0 : index
    %c0_2 = arith.constant 0 : index
    %1 = vector.load %arg3[%c0_1, %c0_2] : memref<17x256xf32, #tpu.memory_space<vmem>>, vector<16x256xf32>
    %cst = arith.constant dense<0.000000e+00> : vector<16x256xf32>
    %2 = tpu.matmul %0, %1, %cst {dimension_numbers = #tpu.dot_dimension_numbers<[1], [0], [0], [1], [0, 0, 1, 1], [], []>} : vector<16x16xf32>, vector<16x256xf32>, vector<16x256xf32> -> vector<16x256xf32>
    %c16 = arith.constant 16 : index
    %c0_3 = arith.constant 0 : index
    %3 = vector.load %arg3[%c16, %c0_3] : memref<17x256xf32, #tpu.memory_space<vmem>>, vector<1x256xf32>
    %c0_4 = arith.constant 0 : index
    %c0_5 = arith.constant 0 : index
    %4 = vector.load %arg4[%c0_4, %c0_5] : memref<64x256xbf16, #tpu.memory_space<vmem>>, vector<64x256xbf16>
    %c0_6 = arith.constant 0 : index
    %c0_7 = arith.constant 0 : index
    %c0_8 = arith.constant 0 : index
    %c0_9 = arith.constant 0 : index
    %5 = vector.load %arg1[%c0_6, %c0_7, %c0_8, %c0_9] : memref<2x2x2x32xf32, #tpu.memory_space<vmem>>, vector<1x1x2x32xf32>
    %6 = vector.shape_cast %5 : vector<1x1x2x32xf32> to vector<2x32xf32>
    %c0_10 = arith.constant 0 : index
    %c1 = arith.constant 1 : index
    %c0_11 = arith.constant 0 : index
    %c0_12 = arith.constant 0 : index
    %7 = vector.load %arg1[%c0_10, %c1, %c0_11, %c0_12] : memref<2x2x2x32xf32, #tpu.memory_space<vmem>>, vector<1x1x2x32xf32>
    %8 = vector.shape_cast %7 : vector<1x1x2x32xf32> to vector<2x32xf32>
    %c1_13 = arith.constant 1 : index
    %c0_14 = arith.constant 0 : index
    %c0_15 = arith.constant 0 : index
    %c0_16 = arith.constant 0 : index
    %9 = vector.load %arg1[%c1_13, %c0_14, %c0_15, %c0_16] : memref<2x2x2x32xf32, #tpu.memory_space<vmem>>, vector<1x1x2x32xf32>
    %10 = vector.shape_cast %9 : vector<1x1x2x32xf32> to vector<2x32xf32>
    %c1_17 = arith.constant 1 : index
    %c1_18 = arith.constant 1 : index
    %c0_19 = arith.constant 0 : index
    %c0_20 = arith.constant 0 : index
    %11 = vector.load %arg1[%c1_17, %c1_18, %c0_19, %c0_20] : memref<2x2x2x32xf32, #tpu.memory_space<vmem>>, vector<1x1x2x32xf32>
    %12 = vector.shape_cast %11 : vector<1x1x2x32xf32> to vector<2x32xf32>
    %13 = tpu.concatenate %6, %8 in 1 : vector<2x32xf32>, vector<2x32xf32> -> vector<2x64xf32>
    %14 = arith.truncf %13 : vector<2x64xf32> to vector<2x64xbf16>
    %cst_21 = arith.constant dense<0.000000e+00> : vector<2x256xf32>
    %15 = tpu.matmul %14, %4, %cst_21 {dimension_numbers = #tpu.dot_dimension_numbers<[1], [0], [0], [1], [0, 0, 1, 1], [], []>} : vector<2x64xbf16>, vector<64x256xbf16>, vector<2x256xf32> -> vector<2x256xf32>
    %16 = vector.broadcast %3 : vector<1x256xf32> to vector<2x256xf32>
    %17 = arith.addf %15, %16 : vector<2x256xf32>
    %18 = vector.extract_strided_slice %2 {offsets = [0, 0], sizes = [2, 256], strides = [1, 1]} : vector<16x256xf32> to vector<2x256xf32>
    %19 = arith.addf %17, %18 : vector<2x256xf32>
    %20 = vector.extract_strided_slice %19 {offsets = [0, 0], sizes = [2, 128], strides = [1, 1]} : vector<2x256xf32> to vector<2x128xf32>
    %21 = vector.extract_strided_slice %20 {offsets = [0, 0], sizes = [2, 96], strides = [1, 1]} : vector<2x128xf32> to vector<2x96xf32>
    %22 = arith.negf %21 : vector<2x96xf32>
    %23 = math.exp %22 : vector<2x96xf32>
    %cst_22 = arith.constant 1.000000e+00 : f32
    %24 = vector.broadcast %cst_22 : f32 to vector<2x96xf32>
    %25 = arith.addf %24, %23 : vector<2x96xf32>
    %26 = arith.divf %24, %25 : vector<2x96xf32>
    %27 = vector.extract_strided_slice %20 {offsets = [0, 96], sizes = [2, 32], strides = [1, 1]} : vector<2x128xf32> to vector<2x32xf32>
    %28 = math.tanh %27 : vector<2x32xf32>
    %29 = vector.extract_strided_slice %26 {offsets = [0, 32], sizes = [2, 32], strides = [1, 1]} : vector<2x96xf32> to vector<2x32xf32>
    %30 = arith.mulf %29, %10 : vector<2x32xf32>
    %31 = vector.extract_strided_slice %26 {offsets = [0, 0], sizes = [2, 32], strides = [1, 1]} : vector<2x96xf32> to vector<2x32xf32>
    %32 = arith.mulf %31, %28 : vector<2x32xf32>
    %33 = arith.addf %30, %32 : vector<2x32xf32>
    %34 = vector.extract_strided_slice %26 {offsets = [0, 64], sizes = [2, 32], strides = [1, 1]} : vector<2x96xf32> to vector<2x32xf32>
    %35 = math.tanh %33 : vector<2x32xf32>
    %36 = arith.mulf %34, %35 : vector<2x32xf32>
    %37 = tpu.concatenate %36, %8 in 1 : vector<2x32xf32>, vector<2x32xf32> -> vector<2x64xf32>
    %38 = arith.truncf %37 : vector<2x64xf32> to vector<2x64xbf16>
    %cst_23 = arith.constant dense<0.000000e+00> : vector<2x256xf32>
    %39 = tpu.matmul %38, %4, %cst_23 {dimension_numbers = #tpu.dot_dimension_numbers<[1], [0], [0], [1], [0, 0, 1, 1], [], []>} : vector<2x64xbf16>, vector<64x256xbf16>, vector<2x256xf32> -> vector<2x256xf32>
    %40 = vector.broadcast %3 : vector<1x256xf32> to vector<2x256xf32>
    %41 = arith.addf %39, %40 : vector<2x256xf32>
    %42 = vector.extract_strided_slice %2 {offsets = [2, 0], sizes = [2, 256], strides = [1, 1]} : vector<16x256xf32> to vector<2x256xf32>
    %43 = arith.addf %41, %42 : vector<2x256xf32>
    %44 = vector.extract_strided_slice %43 {offsets = [0, 0], sizes = [2, 128], strides = [1, 1]} : vector<2x256xf32> to vector<2x128xf32>
    %45 = vector.extract_strided_slice %44 {offsets = [0, 0], sizes = [2, 96], strides = [1, 1]} : vector<2x128xf32> to vector<2x96xf32>
    %46 = arith.negf %45 : vector<2x96xf32>
    %47 = math.exp %46 : vector<2x96xf32>
    %cst_24 = arith.constant 1.000000e+00 : f32
    %48 = vector.broadcast %cst_24 : f32 to vector<2x96xf32>
    %49 = arith.addf %48, %47 : vector<2x96xf32>
    %50 = arith.divf %48, %49 : vector<2x96xf32>
    %51 = vector.extract_strided_slice %44 {offsets = [0, 96], sizes = [2, 32], strides = [1, 1]} : vector<2x128xf32> to vector<2x32xf32>
    %52 = math.tanh %51 : vector<2x32xf32>
    %53 = vector.extract_strided_slice %50 {offsets = [0, 32], sizes = [2, 32], strides = [1, 1]} : vector<2x96xf32> to vector<2x32xf32>
    %54 = arith.mulf %53, %33 : vector<2x32xf32>
    %55 = vector.extract_strided_slice %50 {offsets = [0, 0], sizes = [2, 32], strides = [1, 1]} : vector<2x96xf32> to vector<2x32xf32>
    %56 = arith.mulf %55, %52 : vector<2x32xf32>
    %57 = arith.addf %54, %56 : vector<2x32xf32>
    %58 = vector.extract_strided_slice %50 {offsets = [0, 64], sizes = [2, 32], strides = [1, 1]} : vector<2x96xf32> to vector<2x32xf32>
    %59 = math.tanh %57 : vector<2x32xf32>
    %60 = arith.mulf %58, %59 : vector<2x32xf32>
    %61 = vector.extract_strided_slice %43 {offsets = [0, 128], sizes = [2, 128], strides = [1, 1]} : vector<2x256xf32> to vector<2x128xf32>
    %62 = vector.extract_strided_slice %61 {offsets = [0, 0], sizes = [2, 96], strides = [1, 1]} : vector<2x128xf32> to vector<2x96xf32>
    %63 = arith.negf %62 : vector<2x96xf32>
    %64 = math.exp %63 : vector<2x96xf32>
    %cst_25 = arith.constant 1.000000e+00 : f32
    %65 = vector.broadcast %cst_25 : f32 to vector<2x96xf32>
    %66 = arith.addf %65, %64 : vector<2x96xf32>
    %67 = arith.divf %65, %66 : vector<2x96xf32>
    %68 = vector.extract_strided_slice %61 {offsets = [0, 96], sizes = [2, 32], strides = [1, 1]} : vector<2x128xf32> to vector<2x32xf32>
    %69 = math.tanh %68 : vector<2x32xf32>
    %70 = vector.extract_strided_slice %67 {offsets = [0, 32], sizes = [2, 32], strides = [1, 1]} : vector<2x96xf32> to vector<2x32xf32>
    %71 = arith.mulf %70, %12 : vector<2x32xf32>
    %72 = vector.extract_strided_slice %67 {offsets = [0, 0], sizes = [2, 32], strides = [1, 1]} : vector<2x96xf32> to vector<2x32xf32>
    %73 = arith.mulf %72, %69 : vector<2x32xf32>
    %74 = arith.addf %71, %73 : vector<2x32xf32>
    %75 = vector.extract_strided_slice %67 {offsets = [0, 64], sizes = [2, 32], strides = [1, 1]} : vector<2x96xf32> to vector<2x32xf32>
    %76 = math.tanh %74 : vector<2x32xf32>
    %77 = arith.mulf %75, %76 : vector<2x32xf32>
    %78 = tpu.concatenate %60, %77 in 1 : vector<2x32xf32>, vector<2x32xf32> -> vector<2x64xf32>
    %79 = arith.truncf %78 : vector<2x64xf32> to vector<2x64xbf16>
    %cst_26 = arith.constant dense<0.000000e+00> : vector<2x256xf32>
    %80 = tpu.matmul %79, %4, %cst_26 {dimension_numbers = #tpu.dot_dimension_numbers<[1], [0], [0], [1], [0, 0, 1, 1], [], []>} : vector<2x64xbf16>, vector<64x256xbf16>, vector<2x256xf32> -> vector<2x256xf32>
    %81 = vector.broadcast %3 : vector<1x256xf32> to vector<2x256xf32>
    %82 = arith.addf %80, %81 : vector<2x256xf32>
    %83 = vector.extract_strided_slice %2 {offsets = [4, 0], sizes = [2, 256], strides = [1, 1]} : vector<16x256xf32> to vector<2x256xf32>
    %84 = arith.addf %82, %83 : vector<2x256xf32>
    %85 = vector.extract_strided_slice %84 {offsets = [0, 0], sizes = [2, 128], strides = [1, 1]} : vector<2x256xf32> to vector<2x128xf32>
    %86 = vector.extract_strided_slice %85 {offsets = [0, 0], sizes = [2, 96], strides = [1, 1]} : vector<2x128xf32> to vector<2x96xf32>
    %87 = arith.negf %86 : vector<2x96xf32>
    %88 = math.exp %87 : vector<2x96xf32>
    %cst_27 = arith.constant 1.000000e+00 : f32
    %89 = vector.broadcast %cst_27 : f32 to vector<2x96xf32>
    %90 = arith.addf %89, %88 : vector<2x96xf32>
    %91 = arith.divf %89, %90 : vector<2x96xf32>
    %92 = vector.extract_strided_slice %85 {offsets = [0, 96], sizes = [2, 32], strides = [1, 1]} : vector<2x128xf32> to vector<2x32xf32>
    %93 = math.tanh %92 : vector<2x32xf32>
    %94 = vector.extract_strided_slice %91 {offsets = [0, 32], sizes = [2, 32], strides = [1, 1]} : vector<2x96xf32> to vector<2x32xf32>
    %95 = arith.mulf %94, %57 : vector<2x32xf32>
    %96 = vector.extract_strided_slice %91 {offsets = [0, 0], sizes = [2, 32], strides = [1, 1]} : vector<2x96xf32> to vector<2x32xf32>
    %97 = arith.mulf %96, %93 : vector<2x32xf32>
    %98 = arith.addf %95, %97 : vector<2x32xf32>
    %99 = vector.extract_strided_slice %91 {offsets = [0, 64], sizes = [2, 32], strides = [1, 1]} : vector<2x96xf32> to vector<2x32xf32>
    %100 = math.tanh %98 : vector<2x32xf32>
    %101 = arith.mulf %99, %100 : vector<2x32xf32>
    %102 = vector.extract_strided_slice %84 {offsets = [0, 128], sizes = [2, 128], strides = [1, 1]} : vector<2x256xf32> to vector<2x128xf32>
    %103 = vector.extract_strided_slice %102 {offsets = [0, 0], sizes = [2, 96], strides = [1, 1]} : vector<2x128xf32> to vector<2x96xf32>
    %104 = arith.negf %103 : vector<2x96xf32>
    %105 = math.exp %104 : vector<2x96xf32>
    %cst_28 = arith.constant 1.000000e+00 : f32
    %106 = vector.broadcast %cst_28 : f32 to vector<2x96xf32>
    %107 = arith.addf %106, %105 : vector<2x96xf32>
    %108 = arith.divf %106, %107 : vector<2x96xf32>
    %109 = vector.extract_strided_slice %102 {offsets = [0, 96], sizes = [2, 32], strides = [1, 1]} : vector<2x128xf32> to vector<2x32xf32>
    %110 = math.tanh %109 : vector<2x32xf32>
    %111 = vector.extract_strided_slice %108 {offsets = [0, 32], sizes = [2, 32], strides = [1, 1]} : vector<2x96xf32> to vector<2x32xf32>
    %112 = arith.mulf %111, %74 : vector<2x32xf32>
    %113 = vector.extract_strided_slice %108 {offsets = [0, 0], sizes = [2, 32], strides = [1, 1]} : vector<2x96xf32> to vector<2x32xf32>
    %114 = arith.mulf %113, %110 : vector<2x32xf32>
    %115 = arith.addf %112, %114 : vector<2x32xf32>
    %116 = vector.extract_strided_slice %108 {offsets = [0, 64], sizes = [2, 32], strides = [1, 1]} : vector<2x96xf32> to vector<2x32xf32>
    %117 = math.tanh %115 : vector<2x32xf32>
    %118 = arith.mulf %116, %117 : vector<2x32xf32>
    %119 = tpu.concatenate %101, %118 in 1 : vector<2x32xf32>, vector<2x32xf32> -> vector<2x64xf32>
    %120 = arith.truncf %119 : vector<2x64xf32> to vector<2x64xbf16>
    %cst_29 = arith.constant dense<0.000000e+00> : vector<2x256xf32>
    %121 = tpu.matmul %120, %4, %cst_29 {dimension_numbers = #tpu.dot_dimension_numbers<[1], [0], [0], [1], [0, 0, 1, 1], [], []>} : vector<2x64xbf16>, vector<64x256xbf16>, vector<2x256xf32> -> vector<2x256xf32>
    %122 = vector.broadcast %3 : vector<1x256xf32> to vector<2x256xf32>
    %123 = arith.addf %121, %122 : vector<2x256xf32>
    %124 = vector.extract_strided_slice %2 {offsets = [6, 0], sizes = [2, 256], strides = [1, 1]} : vector<16x256xf32> to vector<2x256xf32>
    %125 = arith.addf %123, %124 : vector<2x256xf32>
    %126 = vector.extract_strided_slice %125 {offsets = [0, 0], sizes = [2, 128], strides = [1, 1]} : vector<2x256xf32> to vector<2x128xf32>
    %127 = vector.extract_strided_slice %126 {offsets = [0, 0], sizes = [2, 96], strides = [1, 1]} : vector<2x128xf32> to vector<2x96xf32>
    %128 = arith.negf %127 : vector<2x96xf32>
    %129 = math.exp %128 : vector<2x96xf32>
    %cst_30 = arith.constant 1.000000e+00 : f32
    %130 = vector.broadcast %cst_30 : f32 to vector<2x96xf32>
    %131 = arith.addf %130, %129 : vector<2x96xf32>
    %132 = arith.divf %130, %131 : vector<2x96xf32>
    %133 = vector.extract_strided_slice %126 {offsets = [0, 96], sizes = [2, 32], strides = [1, 1]} : vector<2x128xf32> to vector<2x32xf32>
    %134 = math.tanh %133 : vector<2x32xf32>
    %135 = vector.extract_strided_slice %132 {offsets = [0, 32], sizes = [2, 32], strides = [1, 1]} : vector<2x96xf32> to vector<2x32xf32>
    %136 = arith.mulf %135, %98 : vector<2x32xf32>
    %137 = vector.extract_strided_slice %132 {offsets = [0, 0], sizes = [2, 32], strides = [1, 1]} : vector<2x96xf32> to vector<2x32xf32>
    %138 = arith.mulf %137, %134 : vector<2x32xf32>
    %139 = arith.addf %136, %138 : vector<2x32xf32>
    %140 = vector.extract_strided_slice %132 {offsets = [0, 64], sizes = [2, 32], strides = [1, 1]} : vector<2x96xf32> to vector<2x32xf32>
    %141 = math.tanh %139 : vector<2x32xf32>
    %142 = arith.mulf %140, %141 : vector<2x32xf32>
    %143 = vector.extract_strided_slice %125 {offsets = [0, 128], sizes = [2, 128], strides = [1, 1]} : vector<2x256xf32> to vector<2x128xf32>
    %144 = vector.extract_strided_slice %143 {offsets = [0, 0], sizes = [2, 96], strides = [1, 1]} : vector<2x128xf32> to vector<2x96xf32>
    %145 = arith.negf %144 : vector<2x96xf32>
    %146 = math.exp %145 : vector<2x96xf32>
    %cst_31 = arith.constant 1.000000e+00 : f32
    %147 = vector.broadcast %cst_31 : f32 to vector<2x96xf32>
    %148 = arith.addf %147, %146 : vector<2x96xf32>
    %149 = arith.divf %147, %148 : vector<2x96xf32>
    %150 = vector.extract_strided_slice %143 {offsets = [0, 96], sizes = [2, 32], strides = [1, 1]} : vector<2x128xf32> to vector<2x32xf32>
    %151 = math.tanh %150 : vector<2x32xf32>
    %152 = vector.extract_strided_slice %149 {offsets = [0, 32], sizes = [2, 32], strides = [1, 1]} : vector<2x96xf32> to vector<2x32xf32>
    %153 = arith.mulf %152, %115 : vector<2x32xf32>
    %154 = vector.extract_strided_slice %149 {offsets = [0, 0], sizes = [2, 32], strides = [1, 1]} : vector<2x96xf32> to vector<2x32xf32>
    %155 = arith.mulf %154, %151 : vector<2x32xf32>
    %156 = arith.addf %153, %155 : vector<2x32xf32>
    %157 = vector.extract_strided_slice %149 {offsets = [0, 64], sizes = [2, 32], strides = [1, 1]} : vector<2x96xf32> to vector<2x32xf32>
    %158 = math.tanh %156 : vector<2x32xf32>
    %159 = arith.mulf %157, %158 : vector<2x32xf32>
    %160 = tpu.concatenate %142, %159 in 1 : vector<2x32xf32>, vector<2x32xf32> -> vector<2x64xf32>
    %161 = arith.truncf %160 : vector<2x64xf32> to vector<2x64xbf16>
    %cst_32 = arith.constant dense<0.000000e+00> : vector<2x256xf32>
    %162 = tpu.matmul %161, %4, %cst_32 {dimension_numbers = #tpu.dot_dimension_numbers<[1], [0], [0], [1], [0, 0, 1, 1], [], []>} : vector<2x64xbf16>, vector<64x256xbf16>, vector<2x256xf32> -> vector<2x256xf32>
    %163 = vector.broadcast %3 : vector<1x256xf32> to vector<2x256xf32>
    %164 = arith.addf %162, %163 : vector<2x256xf32>
    %165 = vector.extract_strided_slice %2 {offsets = [8, 0], sizes = [2, 256], strides = [1, 1]} : vector<16x256xf32> to vector<2x256xf32>
    %166 = arith.addf %164, %165 : vector<2x256xf32>
    %167 = vector.extract_strided_slice %166 {offsets = [0, 0], sizes = [2, 128], strides = [1, 1]} : vector<2x256xf32> to vector<2x128xf32>
    %168 = vector.extract_strided_slice %167 {offsets = [0, 0], sizes = [2, 96], strides = [1, 1]} : vector<2x128xf32> to vector<2x96xf32>
    %169 = arith.negf %168 : vector<2x96xf32>
    %170 = math.exp %169 : vector<2x96xf32>
    %cst_33 = arith.constant 1.000000e+00 : f32
    %171 = vector.broadcast %cst_33 : f32 to vector<2x96xf32>
    %172 = arith.addf %171, %170 : vector<2x96xf32>
    %173 = arith.divf %171, %172 : vector<2x96xf32>
    %174 = vector.extract_strided_slice %167 {offsets = [0, 96], sizes = [2, 32], strides = [1, 1]} : vector<2x128xf32> to vector<2x32xf32>
    %175 = math.tanh %174 : vector<2x32xf32>
    %176 = vector.extract_strided_slice %173 {offsets = [0, 32], sizes = [2, 32], strides = [1, 1]} : vector<2x96xf32> to vector<2x32xf32>
    %177 = arith.mulf %176, %139 : vector<2x32xf32>
    %178 = vector.extract_strided_slice %173 {offsets = [0, 0], sizes = [2, 32], strides = [1, 1]} : vector<2x96xf32> to vector<2x32xf32>
    %179 = arith.mulf %178, %175 : vector<2x32xf32>
    %180 = arith.addf %177, %179 : vector<2x32xf32>
    %181 = vector.extract_strided_slice %173 {offsets = [0, 64], sizes = [2, 32], strides = [1, 1]} : vector<2x96xf32> to vector<2x32xf32>
    %182 = math.tanh %180 : vector<2x32xf32>
    %183 = arith.mulf %181, %182 : vector<2x32xf32>
    %184 = vector.extract_strided_slice %166 {offsets = [0, 128], sizes = [2, 128], strides = [1, 1]} : vector<2x256xf32> to vector<2x128xf32>
    %185 = vector.extract_strided_slice %184 {offsets = [0, 0], sizes = [2, 96], strides = [1, 1]} : vector<2x128xf32> to vector<2x96xf32>
    %186 = arith.negf %185 : vector<2x96xf32>
    %187 = math.exp %186 : vector<2x96xf32>
    %cst_34 = arith.constant 1.000000e+00 : f32
    %188 = vector.broadcast %cst_34 : f32 to vector<2x96xf32>
    %189 = arith.addf %188, %187 : vector<2x96xf32>
    %190 = arith.divf %188, %189 : vector<2x96xf32>
    %191 = vector.extract_strided_slice %184 {offsets = [0, 96], sizes = [2, 32], strides = [1, 1]} : vector<2x128xf32> to vector<2x32xf32>
    %192 = math.tanh %191 : vector<2x32xf32>
    %193 = vector.extract_strided_slice %190 {offsets = [0, 32], sizes = [2, 32], strides = [1, 1]} : vector<2x96xf32> to vector<2x32xf32>
    %194 = arith.mulf %193, %156 : vector<2x32xf32>
    %195 = vector.extract_strided_slice %190 {offsets = [0, 0], sizes = [2, 32], strides = [1, 1]} : vector<2x96xf32> to vector<2x32xf32>
    %196 = arith.mulf %195, %192 : vector<2x32xf32>
    %197 = arith.addf %194, %196 : vector<2x32xf32>
    %198 = vector.extract_strided_slice %190 {offsets = [0, 64], sizes = [2, 32], strides = [1, 1]} : vector<2x96xf32> to vector<2x32xf32>
    %199 = math.tanh %197 : vector<2x32xf32>
    %200 = arith.mulf %198, %199 : vector<2x32xf32>
    %201 = tpu.concatenate %183, %200 in 1 : vector<2x32xf32>, vector<2x32xf32> -> vector<2x64xf32>
    %202 = arith.truncf %201 : vector<2x64xf32> to vector<2x64xbf16>
    %cst_35 = arith.constant dense<0.000000e+00> : vector<2x256xf32>
    %203 = tpu.matmul %202, %4, %cst_35 {dimension_numbers = #tpu.dot_dimension_numbers<[1], [0], [0], [1], [0, 0, 1, 1], [], []>} : vector<2x64xbf16>, vector<64x256xbf16>, vector<2x256xf32> -> vector<2x256xf32>
    %204 = vector.broadcast %3 : vector<1x256xf32> to vector<2x256xf32>
    %205 = arith.addf %203, %204 : vector<2x256xf32>
    %206 = vector.extract_strided_slice %2 {offsets = [10, 0], sizes = [2, 256], strides = [1, 1]} : vector<16x256xf32> to vector<2x256xf32>
    %207 = arith.addf %205, %206 : vector<2x256xf32>
    %208 = vector.extract_strided_slice %207 {offsets = [0, 0], sizes = [2, 128], strides = [1, 1]} : vector<2x256xf32> to vector<2x128xf32>
    %209 = vector.extract_strided_slice %208 {offsets = [0, 0], sizes = [2, 96], strides = [1, 1]} : vector<2x128xf32> to vector<2x96xf32>
    %210 = arith.negf %209 : vector<2x96xf32>
    %211 = math.exp %210 : vector<2x96xf32>
    %cst_36 = arith.constant 1.000000e+00 : f32
    %212 = vector.broadcast %cst_36 : f32 to vector<2x96xf32>
    %213 = arith.addf %212, %211 : vector<2x96xf32>
    %214 = arith.divf %212, %213 : vector<2x96xf32>
    %215 = vector.extract_strided_slice %208 {offsets = [0, 96], sizes = [2, 32], strides = [1, 1]} : vector<2x128xf32> to vector<2x32xf32>
    %216 = math.tanh %215 : vector<2x32xf32>
    %217 = vector.extract_strided_slice %214 {offsets = [0, 32], sizes = [2, 32], strides = [1, 1]} : vector<2x96xf32> to vector<2x32xf32>
    %218 = arith.mulf %217, %180 : vector<2x32xf32>
    %219 = vector.extract_strided_slice %214 {offsets = [0, 0], sizes = [2, 32], strides = [1, 1]} : vector<2x96xf32> to vector<2x32xf32>
    %220 = arith.mulf %219, %216 : vector<2x32xf32>
    %221 = arith.addf %218, %220 : vector<2x32xf32>
    %222 = vector.extract_strided_slice %214 {offsets = [0, 64], sizes = [2, 32], strides = [1, 1]} : vector<2x96xf32> to vector<2x32xf32>
    %223 = math.tanh %221 : vector<2x32xf32>
    %224 = arith.mulf %222, %223 : vector<2x32xf32>
    %225 = vector.extract_strided_slice %207 {offsets = [0, 128], sizes = [2, 128], strides = [1, 1]} : vector<2x256xf32> to vector<2x128xf32>
    %226 = vector.extract_strided_slice %225 {offsets = [0, 0], sizes = [2, 96], strides = [1, 1]} : vector<2x128xf32> to vector<2x96xf32>
    %227 = arith.negf %226 : vector<2x96xf32>
    %228 = math.exp %227 : vector<2x96xf32>
    %cst_37 = arith.constant 1.000000e+00 : f32
    %229 = vector.broadcast %cst_37 : f32 to vector<2x96xf32>
    %230 = arith.addf %229, %228 : vector<2x96xf32>
    %231 = arith.divf %229, %230 : vector<2x96xf32>
    %232 = vector.extract_strided_slice %225 {offsets = [0, 96], sizes = [2, 32], strides = [1, 1]} : vector<2x128xf32> to vector<2x32xf32>
    %233 = math.tanh %232 : vector<2x32xf32>
    %234 = vector.extract_strided_slice %231 {offsets = [0, 32], sizes = [2, 32], strides = [1, 1]} : vector<2x96xf32> to vector<2x32xf32>
    %235 = arith.mulf %234, %197 : vector<2x32xf32>
    %236 = vector.extract_strided_slice %231 {offsets = [0, 0], sizes = [2, 32], strides = [1, 1]} : vector<2x96xf32> to vector<2x32xf32>
    %237 = arith.mulf %236, %233 : vector<2x32xf32>
    %238 = arith.addf %235, %237 : vector<2x32xf32>
    %239 = vector.extract_strided_slice %231 {offsets = [0, 64], sizes = [2, 32], strides = [1, 1]} : vector<2x96xf32> to vector<2x32xf32>
    %240 = math.tanh %238 : vector<2x32xf32>
    %241 = arith.mulf %239, %240 : vector<2x32xf32>
    %242 = tpu.concatenate %224, %241 in 1 : vector<2x32xf32>, vector<2x32xf32> -> vector<2x64xf32>
    %243 = arith.truncf %242 : vector<2x64xf32> to vector<2x64xbf16>
    %cst_38 = arith.constant dense<0.000000e+00> : vector<2x256xf32>
    %244 = tpu.matmul %243, %4, %cst_38 {dimension_numbers = #tpu.dot_dimension_numbers<[1], [0], [0], [1], [0, 0, 1, 1], [], []>} : vector<2x64xbf16>, vector<64x256xbf16>, vector<2x256xf32> -> vector<2x256xf32>
    %245 = vector.broadcast %3 : vector<1x256xf32> to vector<2x256xf32>
    %246 = arith.addf %244, %245 : vector<2x256xf32>
    %247 = vector.extract_strided_slice %2 {offsets = [12, 0], sizes = [2, 256], strides = [1, 1]} : vector<16x256xf32> to vector<2x256xf32>
    %248 = arith.addf %246, %247 : vector<2x256xf32>
    %249 = vector.extract_strided_slice %248 {offsets = [0, 0], sizes = [2, 128], strides = [1, 1]} : vector<2x256xf32> to vector<2x128xf32>
    %250 = vector.extract_strided_slice %249 {offsets = [0, 0], sizes = [2, 96], strides = [1, 1]} : vector<2x128xf32> to vector<2x96xf32>
    %251 = arith.negf %250 : vector<2x96xf32>
    %252 = math.exp %251 : vector<2x96xf32>
    %cst_39 = arith.constant 1.000000e+00 : f32
    %253 = vector.broadcast %cst_39 : f32 to vector<2x96xf32>
    %254 = arith.addf %253, %252 : vector<2x96xf32>
    %255 = arith.divf %253, %254 : vector<2x96xf32>
    %256 = vector.extract_strided_slice %249 {offsets = [0, 96], sizes = [2, 32], strides = [1, 1]} : vector<2x128xf32> to vector<2x32xf32>
    %257 = math.tanh %256 : vector<2x32xf32>
    %258 = vector.extract_strided_slice %255 {offsets = [0, 32], sizes = [2, 32], strides = [1, 1]} : vector<2x96xf32> to vector<2x32xf32>
    %259 = arith.mulf %258, %221 : vector<2x32xf32>
    %260 = vector.extract_strided_slice %255 {offsets = [0, 0], sizes = [2, 32], strides = [1, 1]} : vector<2x96xf32> to vector<2x32xf32>
    %261 = arith.mulf %260, %257 : vector<2x32xf32>
    %262 = arith.addf %259, %261 : vector<2x32xf32>
    %263 = vector.extract_strided_slice %255 {offsets = [0, 64], sizes = [2, 32], strides = [1, 1]} : vector<2x96xf32> to vector<2x32xf32>
    %264 = math.tanh %262 : vector<2x32xf32>
    %265 = arith.mulf %263, %264 : vector<2x32xf32>
    %266 = vector.extract_strided_slice %248 {offsets = [0, 128], sizes = [2, 128], strides = [1, 1]} : vector<2x256xf32> to vector<2x128xf32>
    %267 = vector.extract_strided_slice %266 {offsets = [0, 0], sizes = [2, 96], strides = [1, 1]} : vector<2x128xf32> to vector<2x96xf32>
    %268 = arith.negf %267 : vector<2x96xf32>
    %269 = math.exp %268 : vector<2x96xf32>
    %cst_40 = arith.constant 1.000000e+00 : f32
    %270 = vector.broadcast %cst_40 : f32 to vector<2x96xf32>
    %271 = arith.addf %270, %269 : vector<2x96xf32>
    %272 = arith.divf %270, %271 : vector<2x96xf32>
    %273 = vector.extract_strided_slice %266 {offsets = [0, 96], sizes = [2, 32], strides = [1, 1]} : vector<2x128xf32> to vector<2x32xf32>
    %274 = math.tanh %273 : vector<2x32xf32>
    %275 = vector.extract_strided_slice %272 {offsets = [0, 32], sizes = [2, 32], strides = [1, 1]} : vector<2x96xf32> to vector<2x32xf32>
    %276 = arith.mulf %275, %238 : vector<2x32xf32>
    %277 = vector.extract_strided_slice %272 {offsets = [0, 0], sizes = [2, 32], strides = [1, 1]} : vector<2x96xf32> to vector<2x32xf32>
    %278 = arith.mulf %277, %274 : vector<2x32xf32>
    %279 = arith.addf %276, %278 : vector<2x32xf32>
    %280 = vector.extract_strided_slice %272 {offsets = [0, 64], sizes = [2, 32], strides = [1, 1]} : vector<2x96xf32> to vector<2x32xf32>
    %281 = math.tanh %279 : vector<2x32xf32>
    %282 = arith.mulf %280, %281 : vector<2x32xf32>
    %283 = tpu.concatenate %265, %282 in 1 : vector<2x32xf32>, vector<2x32xf32> -> vector<2x64xf32>
    %284 = arith.truncf %283 : vector<2x64xf32> to vector<2x64xbf16>
    %cst_41 = arith.constant dense<0.000000e+00> : vector<2x256xf32>
    %285 = tpu.matmul %284, %4, %cst_41 {dimension_numbers = #tpu.dot_dimension_numbers<[1], [0], [0], [1], [0, 0, 1, 1], [], []>} : vector<2x64xbf16>, vector<64x256xbf16>, vector<2x256xf32> -> vector<2x256xf32>
    %286 = vector.broadcast %3 : vector<1x256xf32> to vector<2x256xf32>
    %287 = arith.addf %285, %286 : vector<2x256xf32>
    %288 = vector.extract_strided_slice %2 {offsets = [14, 0], sizes = [2, 256], strides = [1, 1]} : vector<16x256xf32> to vector<2x256xf32>
    %289 = arith.addf %287, %288 : vector<2x256xf32>
    %290 = vector.extract_strided_slice %289 {offsets = [0, 0], sizes = [2, 128], strides = [1, 1]} : vector<2x256xf32> to vector<2x128xf32>
    %291 = vector.extract_strided_slice %290 {offsets = [0, 0], sizes = [2, 96], strides = [1, 1]} : vector<2x128xf32> to vector<2x96xf32>
    %292 = arith.negf %291 : vector<2x96xf32>
    %293 = math.exp %292 : vector<2x96xf32>
    %cst_42 = arith.constant 1.000000e+00 : f32
    %294 = vector.broadcast %cst_42 : f32 to vector<2x96xf32>
    %295 = arith.addf %294, %293 : vector<2x96xf32>
    %296 = arith.divf %294, %295 : vector<2x96xf32>
    %297 = vector.extract_strided_slice %290 {offsets = [0, 96], sizes = [2, 32], strides = [1, 1]} : vector<2x128xf32> to vector<2x32xf32>
    %298 = math.tanh %297 : vector<2x32xf32>
    %299 = vector.extract_strided_slice %296 {offsets = [0, 32], sizes = [2, 32], strides = [1, 1]} : vector<2x96xf32> to vector<2x32xf32>
    %300 = arith.mulf %299, %262 : vector<2x32xf32>
    %301 = vector.extract_strided_slice %296 {offsets = [0, 0], sizes = [2, 32], strides = [1, 1]} : vector<2x96xf32> to vector<2x32xf32>
    %302 = arith.mulf %301, %298 : vector<2x32xf32>
    %303 = arith.addf %300, %302 : vector<2x32xf32>
    %304 = vector.extract_strided_slice %296 {offsets = [0, 64], sizes = [2, 32], strides = [1, 1]} : vector<2x96xf32> to vector<2x32xf32>
    %305 = math.tanh %303 : vector<2x32xf32>
    %306 = arith.mulf %304, %305 : vector<2x32xf32>
    %307 = vector.extract_strided_slice %289 {offsets = [0, 128], sizes = [2, 128], strides = [1, 1]} : vector<2x256xf32> to vector<2x128xf32>
    %308 = vector.extract_strided_slice %307 {offsets = [0, 0], sizes = [2, 96], strides = [1, 1]} : vector<2x128xf32> to vector<2x96xf32>
    %309 = arith.negf %308 : vector<2x96xf32>
    %310 = math.exp %309 : vector<2x96xf32>
    %cst_43 = arith.constant 1.000000e+00 : f32
    %311 = vector.broadcast %cst_43 : f32 to vector<2x96xf32>
    %312 = arith.addf %311, %310 : vector<2x96xf32>
    %313 = arith.divf %311, %312 : vector<2x96xf32>
    %314 = vector.extract_strided_slice %307 {offsets = [0, 96], sizes = [2, 32], strides = [1, 1]} : vector<2x128xf32> to vector<2x32xf32>
    %315 = math.tanh %314 : vector<2x32xf32>
    %316 = vector.extract_strided_slice %313 {offsets = [0, 32], sizes = [2, 32], strides = [1, 1]} : vector<2x96xf32> to vector<2x32xf32>
    %317 = arith.mulf %316, %279 : vector<2x32xf32>
    %318 = vector.extract_strided_slice %313 {offsets = [0, 0], sizes = [2, 32], strides = [1, 1]} : vector<2x96xf32> to vector<2x32xf32>
    %319 = arith.mulf %318, %315 : vector<2x32xf32>
    %320 = arith.addf %317, %319 : vector<2x32xf32>
    %321 = vector.extract_strided_slice %313 {offsets = [0, 64], sizes = [2, 32], strides = [1, 1]} : vector<2x96xf32> to vector<2x32xf32>
    %322 = math.tanh %320 : vector<2x32xf32>
    %323 = arith.mulf %321, %322 : vector<2x32xf32>
    %324 = tpu.concatenate %306, %323 in 1 : vector<2x32xf32>, vector<2x32xf32> -> vector<2x64xf32>
    %325 = arith.truncf %324 : vector<2x64xf32> to vector<2x64xbf16>
    %cst_44 = arith.constant dense<0.000000e+00> : vector<2x256xf32>
    %326 = tpu.matmul %325, %4, %cst_44 {dimension_numbers = #tpu.dot_dimension_numbers<[1], [0], [0], [1], [0, 0, 1, 1], [], []>} : vector<2x64xbf16>, vector<64x256xbf16>, vector<2x256xf32> -> vector<2x256xf32>
    %327 = vector.broadcast %3 : vector<1x256xf32> to vector<2x256xf32>
    %328 = arith.addf %326, %327 : vector<2x256xf32>
    %329 = vector.extract_strided_slice %328 {offsets = [0, 128], sizes = [2, 128], strides = [1, 1]} : vector<2x256xf32> to vector<2x128xf32>
    %330 = vector.extract_strided_slice %329 {offsets = [0, 0], sizes = [2, 96], strides = [1, 1]} : vector<2x128xf32> to vector<2x96xf32>
    %331 = arith.negf %330 : vector<2x96xf32>
    %332 = math.exp %331 : vector<2x96xf32>
    %cst_45 = arith.constant 1.000000e+00 : f32
    %333 = vector.broadcast %cst_45 : f32 to vector<2x96xf32>
    %334 = arith.addf %333, %332 : vector<2x96xf32>
    %335 = arith.divf %333, %334 : vector<2x96xf32>
    %336 = vector.extract_strided_slice %329 {offsets = [0, 96], sizes = [2, 32], strides = [1, 1]} : vector<2x128xf32> to vector<2x32xf32>
    %337 = math.tanh %336 : vector<2x32xf32>
    %338 = vector.extract_strided_slice %335 {offsets = [0, 32], sizes = [2, 32], strides = [1, 1]} : vector<2x96xf32> to vector<2x32xf32>
    %339 = arith.mulf %338, %320 : vector<2x32xf32>
    %340 = vector.extract_strided_slice %335 {offsets = [0, 0], sizes = [2, 32], strides = [1, 1]} : vector<2x96xf32> to vector<2x32xf32>
    %341 = arith.mulf %340, %337 : vector<2x32xf32>
    %342 = arith.addf %339, %341 : vector<2x32xf32>
    %343 = vector.extract_strided_slice %335 {offsets = [0, 64], sizes = [2, 32], strides = [1, 1]} : vector<2x96xf32> to vector<2x32xf32>
    %344 = math.tanh %342 : vector<2x32xf32>
    %345 = arith.mulf %343, %344 : vector<2x32xf32>
    %c0_46 = arith.constant 0 : index
    %c0_47 = arith.constant 0 : index
    %c0_48 = arith.constant 0 : index
    %c0_49 = arith.constant 0 : index
    %346 = vector.load %arg8[%c0_46, %c0_47, %c0_48, %c0_49] : memref<2x2x2x32xf32, #tpu.memory_space<vmem>>, vector<1x1x2x32xf32>
    %347 = vector.shape_cast %346 : vector<1x1x2x32xf32> to vector<2x32xf32>
    %348 = vector.shape_cast %306 : vector<2x32xf32> to vector<1x1x2x32xf32>
    tpu.vector_store %arg8[%c0_46, %c0_47, %c0_48, %c0_49], %348 {strides = array<i32>} : memref<2x2x2x32xf32, #tpu.memory_space<vmem>>, vector<1x1x2x32xf32>,
    %c1_50 = arith.constant 1 : index
    %c0_51 = arith.constant 0 : index
    %c0_52 = arith.constant 0 : index
    %c0_53 = arith.constant 0 : index
    %349 = vector.load %arg8[%c1_50, %c0_51, %c0_52, %c0_53] : memref<2x2x2x32xf32, #tpu.memory_space<vmem>>, vector<1x1x2x32xf32>
    %350 = vector.shape_cast %349 : vector<1x1x2x32xf32> to vector<2x32xf32>
    %351 = vector.shape_cast %303 : vector<2x32xf32> to vector<1x1x2x32xf32>
    tpu.vector_store %arg8[%c1_50, %c0_51, %c0_52, %c0_53], %351 {strides = array<i32>} : memref<2x2x2x32xf32, #tpu.memory_space<vmem>>, vector<1x1x2x32xf32>,
    %c0_54 = arith.constant 0 : index
    %c1_55 = arith.constant 1 : index
    %c0_56 = arith.constant 0 : index
    %c0_57 = arith.constant 0 : index
    %352 = vector.load %arg8[%c0_54, %c1_55, %c0_56, %c0_57] : memref<2x2x2x32xf32, #tpu.memory_space<vmem>>, vector<1x1x2x32xf32>
    %353 = vector.shape_cast %352 : vector<1x1x2x32xf32> to vector<2x32xf32>
    %354 = vector.shape_cast %345 : vector<2x32xf32> to vector<1x1x2x32xf32>
    tpu.vector_store %arg8[%c0_54, %c1_55, %c0_56, %c0_57], %354 {strides = array<i32>} : memref<2x2x2x32xf32, #tpu.memory_space<vmem>>, vector<1x1x2x32xf32>,
    %c1_58 = arith.constant 1 : index
    %c1_59 = arith.constant 1 : index
    %c0_60 = arith.constant 0 : index
    %c0_61 = arith.constant 0 : index
    %355 = vector.load %arg8[%c1_58, %c1_59, %c0_60, %c0_61] : memref<2x2x2x32xf32, #tpu.memory_space<vmem>>, vector<1x1x2x32xf32>
    %356 = vector.shape_cast %355 : vector<1x1x2x32xf32> to vector<2x32xf32>
    %357 = vector.shape_cast %342 : vector<2x32xf32> to vector<1x1x2x32xf32>
    tpu.vector_store %arg8[%c1_58, %c1_59, %c0_60, %c0_61], %357 {strides = array<i32>} : memref<2x2x2x32xf32, #tpu.memory_space<vmem>>, vector<1x1x2x32xf32>,
    %c0_62 = arith.constant 0 : index
    %c0_63 = arith.constant 0 : index
    %358 = vector.load %arg2[%c0_62, %c0_63] : memref<2x12xf32, #tpu.memory_space<vmem>>, vector<2x12xf32>
    %c0_64 = arith.constant 0 : index
    %c0_65 = arith.constant 0 : index
    %359 = vector.load %arg5[%c0_64, %c0_65] : memref<83x32xf32, #tpu.memory_space<vmem>>, vector<12x32xf32>
    %cst_66 = arith.constant dense<0.000000e+00> : vector<2x32xf32>
    %360 = tpu.matmul %358, %359, %cst_66 {dimension_numbers = #tpu.dot_dimension_numbers<[1], [0], [0], [1], [0, 0, 1, 1], [], []>} : vector<2x12xf32>, vector<12x32xf32>, vector<2x32xf32> -> vector<2x32xf32>
    %c12 = arith.constant 12 : index
    %c0_67 = arith.constant 0 : index
    %361 = vector.load %arg5[%c12, %c0_67] : memref<83x32xf32, #tpu.memory_space<vmem>>, vector<1x32xf32>
    %362 = vector.broadcast %361 : vector<1x32xf32> to vector<2x32xf32>
    %363 = arith.addf %360, %362 : vector<2x32xf32>
    %cst_68 = arith.constant 0.000000e+00 : f32
    %364 = vector.broadcast %cst_68 : f32 to vector<2x32xf32>
    %365 = arith.cmpf oge, %363, %364 : vector<2x32xf32>
    %cst_69 = arith.constant 2.000000e-01 : f32
    %366 = vector.broadcast %cst_69 : f32 to vector<2x32xf32>
    %367 = arith.mulf %366, %363 : vector<2x32xf32>
    %368 = arith.select %365, %363, %367 : vector<2x32xi1>, vector<2x32xf32>
    %c13 = arith.constant 13 : index
    %c0_70 = arith.constant 0 : index
    %369 = vector.load %arg5[%c13, %c0_70] : memref<83x32xf32, #tpu.memory_space<vmem>>, vector<32x32xf32>
    %cst_71 = arith.constant dense<0.000000e+00> : vector<2x32xf32>
    %370 = tpu.matmul %368, %369, %cst_71 {dimension_numbers = #tpu.dot_dimension_numbers<[1], [0], [0], [1], [0, 0, 1, 1], [], []>} : vector<2x32xf32>, vector<32x32xf32>, vector<2x32xf32> -> vector<2x32xf32>
    %c45 = arith.constant 45 : index
    %c0_72 = arith.constant 0 : index
    %371 = vector.load %arg5[%c45, %c0_72] : memref<83x32xf32, #tpu.memory_space<vmem>>, vector<1x32xf32>
    %372 = vector.broadcast %371 : vector<1x32xf32> to vector<2x32xf32>
    %373 = arith.addf %370, %372 : vector<2x32xf32>
    %c46 = arith.constant 46 : index
    %c0_73 = arith.constant 0 : index
    %374 = vector.load %arg5[%c46, %c0_73] : memref<83x32xf32, #tpu.memory_space<vmem>>, vector<1x32xf32>
    %375 = vector.broadcast %374 : vector<1x32xf32> to vector<2x32xf32>
    %376 = arith.mulf %373, %375 : vector<2x32xf32>
    %c47 = arith.constant 47 : index
    %c0_74 = arith.constant 0 : index
    %377 = vector.load %arg5[%c47, %c0_74] : memref<83x32xf32, #tpu.memory_space<vmem>>, vector<1x32xf32>
    %378 = vector.broadcast %377 : vector<1x32xf32> to vector<2x32xf32>
    %379 = arith.addf %376, %378 : vector<2x32xf32>
    %cst_75 = arith.constant 0.000000e+00 : f32
    %380 = vector.broadcast %cst_75 : f32 to vector<2x32xf32>
    %381 = arith.cmpf oge, %379, %380 : vector<2x32xf32>
    %cst_76 = arith.constant 2.000000e-01 : f32
    %382 = vector.broadcast %cst_76 : f32 to vector<2x32xf32>
    %383 = arith.mulf %382, %379 : vector<2x32xf32>
    %384 = arith.select %381, %379, %383 : vector<2x32xi1>, vector<2x32xf32>
    %c48 = arith.constant 48 : index
    %c0_77 = arith.constant 0 : index
    %385 = vector.load %arg5[%c48, %c0_77] : memref<83x32xf32, #tpu.memory_space<vmem>>, vector<32x32xf32>
    %cst_78 = arith.constant dense<0.000000e+00> : vector<2x32xf32>
    %386 = tpu.matmul %384, %385, %cst_78 {dimension_numbers = #tpu.dot_dimension_numbers<[1], [0], [0], [1], [0, 0, 1, 1], [], []>} : vector<2x32xf32>, vector<32x32xf32>, vector<2x32xf32> -> vector<2x32xf32>
    %c80 = arith.constant 80 : index
    %c0_79 = arith.constant 0 : index
    %387 = vector.load %arg5[%c80, %c0_79] : memref<83x32xf32, #tpu.memory_space<vmem>>, vector<1x32xf32>
    %388 = vector.broadcast %387 : vector<1x32xf32> to vector<2x32xf32>
    %389 = arith.addf %386, %388 : vector<2x32xf32>
    %c81 = arith.constant 81 : index
    %c0_80 = arith.constant 0 : index
    %390 = vector.load %arg5[%c81, %c0_80] : memref<83x32xf32, #tpu.memory_space<vmem>>, vector<1x32xf32>
    %391 = vector.broadcast %390 : vector<1x32xf32> to vector<2x32xf32>
    %392 = arith.mulf %389, %391 : vector<2x32xf32>
    %c82 = arith.constant 82 : index
    %c0_81 = arith.constant 0 : index
    %393 = vector.load %arg5[%c82, %c0_81] : memref<83x32xf32, #tpu.memory_space<vmem>>, vector<1x32xf32>
    %394 = vector.broadcast %393 : vector<1x32xf32> to vector<2x32xf32>
    %395 = arith.addf %392, %394 : vector<2x32xf32>
    %cst_82 = arith.constant 0.000000e+00 : f32
    %396 = vector.broadcast %cst_82 : f32 to vector<2x32xf32>
    %397 = arith.cmpf oge, %395, %396 : vector<2x32xf32>
    %cst_83 = arith.constant 2.000000e-01 : f32
    %398 = vector.broadcast %cst_83 : f32 to vector<2x32xf32>
    %399 = arith.mulf %398, %395 : vector<2x32xf32>
    %400 = arith.select %397, %395, %399 : vector<2x32xi1>, vector<2x32xf32>
    %c0_84 = arith.constant 0 : index
    %c0_85 = arith.constant 0 : index
    %401 = vector.load %arg6[%c0_84, %c0_85] : memref<65x10xf32, #tpu.memory_space<vmem>>, vector<32x10xf32>
    %cst_86 = arith.constant dense<0.000000e+00> : vector<2x10xf32>
    %402 = tpu.matmul %345, %401, %cst_86 {dimension_numbers = #tpu.dot_dimension_numbers<[1], [0], [0], [1], [0, 0, 1, 1], [], []>} : vector<2x32xf32>, vector<32x10xf32>, vector<2x10xf32> -> vector<2x10xf32>
    %c32 = arith.constant 32 : index
    %c0_87 = arith.constant 0 : index
    %403 = vector.load %arg6[%c32, %c0_87] : memref<65x10xf32, #tpu.memory_space<vmem>>, vector<32x10xf32>
    %cst_88 = arith.constant dense<0.000000e+00> : vector<2x10xf32>
    %404 = tpu.matmul %400, %403, %cst_88 {dimension_numbers = #tpu.dot_dimension_numbers<[1], [0], [0], [1], [0, 0, 1, 1], [], []>} : vector<2x32xf32>, vector<32x10xf32>, vector<2x10xf32> -> vector<2x10xf32>
    %405 = arith.addf %402, %404 : vector<2x10xf32>
    %c64 = arith.constant 64 : index
    %c0_89 = arith.constant 0 : index
    %406 = vector.load %arg6[%c64, %c0_89] : memref<65x10xf32, #tpu.memory_space<vmem>>, vector<1x10xf32>
    %407 = vector.broadcast %406 : vector<1x10xf32> to vector<2x10xf32>
    %408 = arith.addf %405, %407 : vector<2x10xf32>
    %c0_90 = arith.constant 0 : index
    %c0_91 = arith.constant 0 : index
    %409 = vector.load %arg7[%c0_90, %c0_91] : memref<2x10xf32, #tpu.memory_space<vmem>>, vector<2x10xf32>
    tpu.vector_store %arg7[%c0_90, %c0_91], %408 {strides = array<i32>} : memref<2x10xf32, #tpu.memory_space<vmem>>, vector<2x10xf32>,
    return
  }
}

</mosaic_0001>

<bundles_post_ra>
// kernel: tpu_custom_call.1
= control target key start
LH: loop header
LB: loop body
LE: loop exit
PB: predicated region body
PF: predicated region fallthrough
CT: control target
= control target key end

     0   :  { %14 = vsyncpa [#allocation3], 0  ;;  %s1954_s29 = smov 32   ;;  %v1955_v4 = vmov 0   ;;  %v1956_v5 = vmov 0.0   ;;  %s2460_s0 = inlined_call_operand.vmem [shape: f32[16,16], index: 0, kind: input, shape index: {}]   ;;  %s2461_s1 = inlined_call_operand.vmem [shape: f32[2,2,2,32], index: 1, kind: input, shape index: {}]   ;;  %s2462_s2 = inlined_call_operand.vmem [shape: f32[2,12], index: 2, kind: input, shape index: {}]   ;;  %s2463_s3 = inlined_call_operand.vmem [shape: f32[17,256], index: 3, kind: input, shape index: {}]   ;;  %s2464_s4 = inlined_call_operand.vmem [shape: bf16[64,256], index: 4, kind: input, shape index: {}]   ;;  %s2465_s5 = inlined_call_operand.vmem [shape: f32[83,32], index: 5, kind: input, shape index: {}]   ;;  %s2466_s6 = inlined_call_operand.vmem [shape: f32[65,10], index: 6, kind: input, shape index: {}]   ;;  %s2467_s7 = inlined_call_operand.hbm [shape: f32[2,10], index: 7, kind: output, shape index: {0}]   ;;  %s2468_s8 = inlined_call_operand.hbm [shape: f32[2,2,2,32], index: 8, kind: output, shape index: {1}]  }
   0x1   :  { %v1599_v0 = vld [vmem:[%s2461_s1 + $0x2] sm:$0x3]  ;;  %v2017_v1 = vld [vmem:[%s2464_s4 + $0x4] ss:$8 sps:$4 sm:$0xff]   ;;  %v2027_v3 = vld [vmem:[%s2464_s4 + $0x14] ss:$8 sps:$4 sm:$0xff]   ;;  %232 = vmatprep.mubr.bf16.mxu1 %v1955_v4  ;;  %108 = vmatprep.mubr.f32.mxu0 %v1956_v5 }
   0x2   :  { %139 = vrot.lane.b32.xlu0 %v1599_v0, %s1954_s29  ;;  %v2022_v2 = vld [vmem:[%s2464_s4] ss:$8 sps:$4 sm:$0xff]   ;;  %200 = vmatprep.subr.bf16.mxu1 %v2017_v1  ;;  %v2036_v6 = vld [vmem:[%s2464_s4 + $0x10] ss:$8 sps:$4 sm:$0xff]   ;;  %v2042_v7 = vld [vmem:[%s2464_s4 + $0x24] ss:$8 sps:$4 sm:$0xff]  }
   0x3   :  { %201 = vmatpush1.bf16.msra.mxu1 %v2022_v2  ;;  %v34_v8 = vld [vmem:[%s2463_s3 + $0x8] sm:$0xff]  ;;  %v36_v9 = vld [vmem:[%s2463_s3 + $0x18] sm:$0xff]  ;;  %v33_v10 = vld [vmem:[%s2463_s3] sm:$0xff] }
   0x4   :  { %202 = vmatprep.subr.bf16.mxu1 %v2027_v3  ;;  %v1723_v11 = vpack.c.bf16 %v36_v9, %v34_v8  ;;  %v35_v12 = vld [vmem:[%s2463_s3 + $0x10] sm:$0xff]  ;;  %v1600_v13 = vld [vmem:[%s2461_s1 + $0x4] sm:$0x3]  ;;  %v2063_v14 = vld [vmem:[%s2464_s4 + $0x20] ss:$8 sps:$4 sm:$0xff]  }
   0x5   :  { %v1725_v15 = vpack.c.bf16 %v35_v12, %v33_v10  ;;  %249 = vrot.lane.b32.xlu1 %v1600_v13, %s1954_s29 }
   0x7   :  { %203 = vmatpush1.bf16.msra.mxu1 %v2036_v6 }
   0x8   :  { %15 = vsyncpa [#allocation5], 0  ;;  %204 = vmatprep.subr.bf16.mxu1 %v2042_v7  ;;  %v2070_v16 = vld [vmem:[%s2464_s4 + $0x34] ss:$8 sps:$4 sm:$0xff]   ;;  %1724 = vmatprep.subr.bf16.mxu0 %v1723_v11  ;;  %v31_v17 = vld [vmem:[%s2460_s0] sm:$0xff]  ;;  %vm37_vm0 = vcmask 130048   ;;  %v146_v25 = vlaneseq }
   0x9   :  { %1726 = vmatpush1.bf16.msra.mxu0 %v1725_v15  ;;  %v2080_v18 = vld [vmem:[%s2464_s4 + $0x30] ss:$8 sps:$4 sm:$0xff]   ;;  %vm142_vm1 = vcmask 261120   ;;  %v131_v19 = vld [vmem:[%s2461_s1] sm:$0x3]  ;;  %vm196_vm2 = vcmask 523264  }
   0xa   :  { %278 = vmatprep.subr.bf16.mxu0 %v2017_v1  ;;  %v147_v26 = vshrl.u32 %v146_v25, 7  ;;  %v1598_v28 = vld [vmem:[%s2463_s3 + $0x20] ss:$8 sm:$0x3]  ;;  %s1957_s19 = smov 64   ;;  %vm1134_vm3 = vcmask 1043456  }
   0xb   :  { %205 = vmatpush1.bf16.msra.mxu1 %v2063_v14  ;;  %v32_v47 = vld [vmem:[%s2460_s0 + $0x8] sm:$0xff]  ;;  %v1601_v13 = vld [vmem:[%s2461_s1 + $0x6] sm:$0x3]  ;;  %s1958_s1 = smov 96   ;;  %vm1960_vm4 = vmmov 1   ;;  %vm1961_vm6 = vmmov 0  }
   0xc   :  { %206 = vmatprep.subr.bf16.mxu1 %v2070_v16  ;;  %1596 = vmatmul.mubr.msk.f32.vlgmr.msra.gmra.mrb[0].mxu0 %vm37_vm0, %v31_v17  ;;  %v148_v27 = vsub.s32 0, %v147_v26  ;;  %v152_v56 = vsub.s32 1, %v147_v26  ;;  %vm1729_vm5 = vmpackc.low %vm1134_vm3, %vm1960_vm4  ;;  %vm1130_vm7 = vcmask 97280   ;;  %vm1102_vm8 = vcmask 254976  }
   0xd   :  { %279 = vmatpush1.bf16.msra.mxu0 %v2022_v2  ;;  %114 = vmatprep.mubr.f32.mxu0 %v1956_v5 }
   0xe   :  { %280 = vmatprep.subr.bf16.mxu0 %v2027_v3  ;;  %v2116_v29 = vrot.slane %v1598_v28, %v148_v27  ;;  %v2147_v57 = vrot.slane %v1598_v28, %v152_v56 }
   0xf   :  { %207 = vmatpush1.bf16.msra.mxu1 %v2080_v18 }
  0x10   :  { %392 = vmatprep.subr.bf16.mxu1 %v2017_v1  ;;  %1597 = vmatmul.mubr.msk.f32.gmra.mrb[2].mxu0 %vm37_vm0, %v32_v47 }
  0x11   :  { %281 = vmatpush1.bf16.msra.mxu0 %v2036_v6  ;;  %310 = vmatprep.mubr.bf16.mxu0 %v1955_v4 }
  0x12   :  { %282 = vmatprep.subr.bf16.mxu0 %v2042_v7 }
  0x15   :  { %283 = vmatpush1.bf16.msra.mxu0 %v2063_v14 }
  0x16   :  { %284 = vmatprep.subr.bf16.mxu0 %v2070_v16 }
  0x19   :  { %285 = vmatpush1.bf16.msra.mxu0 %v2080_v18 }
  0x1a   :  { %500 = vmatprep.subr.bf16.mxu0 %v2017_v1 }
  0x74   :  { %v140_v20 = vpop.permute.xlu0 %139 }
  0x75   :  { %v143_v21 = vsel %vm142_vm1, %v131_v19, %v140_v20 }
  0x76   :  { %v144_v22 = vpack.c.bf16 %v143_v21, %v143_v21 }
  0x77   :  { %v250_v43 = vpop.permute.xlu1 %249 }
  0x78   :  { %1610 = vmatmul.mubr.msk.bf16.vlgmr.msra.gmra.mrb[0].mxu1 %vm196_vm2, %v144_v22 }
  0x79   :  { %393 = vmatpush1.bf16.msra.mxu1 %v2022_v2  ;;  %424 = vmatprep.mubr.bf16.mxu1 %v1955_v4 }
  0x7a   :  { %394 = vmatprep.subr.bf16.mxu1 %v2027_v3 }
  0x7d   :  { %395 = vmatpush1.bf16.msra.mxu1 %v2036_v6 }
  0x7e   :  { %396 = vmatprep.subr.bf16.mxu1 %v2042_v7 }
  0x81   :  { %397 = vmatpush1.bf16.msra.mxu1 %v2063_v14 }
  0x82   :  { %398 = vmatprep.subr.bf16.mxu1 %v2070_v16 }
  0x85   :  { %399 = vmatpush1.bf16.msra.mxu1 %v2080_v18 }
  0x86   :  { %608 = vmatprep.subr.bf16.mxu1 %v2017_v1 }
  0xdf   :  { %v2109_v23 = vpop.f32.mrb[0].mxu0 }
  0xe0   :  { %v2111_v24 = vpop.f32.mrb[1].mxu0  ;;  %v321_v60 = vrot.slane %v2109_v23, 2 }
  0xe1   :  { %v322_v62 = vrot.slane %v2111_v24, 2 }
  0xe3   :  { %v2132_v51 = vpop.f32.mrb[2].mxu0 }
  0xe4   :  { %v2134_v52 = vpop.f32.mrb[3].mxu0 }
 0x14b   :  { %v234_v30 = vpop.f32.mrb[0].mxu1 }
 0x14c   :  { %v235_v31 = vadd.f32 %v234_v30, %v2116_v29  ;;  %v236_v32 = vpop.f32.mrb[1].mxu1 }
 0x14d   :  { %v237_v33 = vpop.f32.mrb[2].mxu1 }
 0x14e   :  { %v240_v34 = vadd.f32 %v235_v31, %v2109_v23  ;;  %v238_v35 = vpop.f32.mrb[3].mxu1 }
 0x150   :  { %1778 = vtanh.f32 %v240_v34  ;;  %v1611_v37 = vmul.f32 -1.442695, %v240_v34 }
 0x152   :  { %1780 = vpow2.f32 %v1611_v37 }
 0x15a   :  { %v1779_v36 = vpop.eup %1778 }
 0x15b   :  { %254 = vrot.lane.b32.xlu0 %v1779_v36, %s1954_s29 }
 0x15c   :  { %v1781_v38 = vpop.eup %1780 }
 0x15d   :  { %v244_v39 = vadd.f32 1.0, %v1781_v38 }
 0x15f   :  { %1782 = vrcp.f32 %v244_v39 }
 0x169   :  { %v1783_v40 = vpop.eup %1782 }
 0x16a   :  { %v252_v44 = vmul.f32 %v1783_v40, %v250_v43 }
 0x1cd   :  { %v255_v41 = vpop.permute.xlu0 %254 }
 0x1ce   :  { %v257_v42 = vmul.f32 %v1783_v40, %v255_v41 }
 0x1d0   :  { %259 = vrot.lane.b32.xlu1 %v257_v42, %s1954_s29 }
 0x242   :  { %v260_v45 = vpop.permute.xlu1 %259 }
 0x243   :  { %v2122_v46 = vadd.f32 %v260_v45, %v252_v44 }
 0x245   :  { %1784 = vtanh.f32 %v2122_v46 }
 0x24f   :  { %v1785_v48 = vpop.eup %1784 }
 0x250   :  { %265 = vrot.lane.b32.xlu0 %v1785_v48, %s1954_s29 }
 0x2c2   :  { %v266_v49 = vpop.permute.xlu0 %265 }
 0x2c3   :  { %v268_v50 = vmul.f32 %v1783_v40, %v266_v49 }
 0x2c5   :  { %270 = vrot.lane.b32.xlu1 %v268_v50, %s1957_s19 }
 0x337   :  { %v271_v53 = vpop.permute.xlu1 %270 }
 0x338   :  { %v273_v54 = vsel %vm142_vm1, %v271_v53, %v140_v20  ;;  %v433_v53 = vrot.slane %v2109_v23, 4 }
 0x339   :  { %v274_v55 = vpack.c.bf16 %v273_v54, %v273_v54 }
 0x33b   :  { %1612 = vmatmul.mubr.msk.bf16.vlgmr.msra.gmra.mrb[4].mxu0 %vm196_vm2, %v274_v55  ;;  %v434_v55 = vrot.slane %v2111_v24, 4 }
 0x33c   :  { %501 = vmatpush1.bf16.msra.mxu0 %v2022_v2  ;;  %532 = vmatprep.mubr.bf16.mxu0 %v1955_v4 }
 0x33d   :  { %502 = vmatprep.subr.bf16.mxu0 %v2027_v3 }
 0x340   :  { %503 = vmatpush1.bf16.msra.mxu0 %v2036_v6 }
 0x341   :  { %504 = vmatprep.subr.bf16.mxu0 %v2042_v7 }
 0x344   :  { %505 = vmatpush1.bf16.msra.mxu0 %v2063_v14 }
 0x345   :  { %506 = vmatprep.subr.bf16.mxu0 %v2070_v16 }
 0x348   :  { %507 = vmatpush1.bf16.msra.mxu0 %v2080_v18 }
 0x349   :  { %712 = vmatprep.subr.bf16.mxu0 %v2017_v1 }
 0x40e   :  { %v312_v58 = vpop.f32.mrb[4].mxu0 }
 0x40f   :  { %v313_v59 = vadd.f32 %v312_v58, %v2116_v29  ;;  %v314_v61 = vpop.f32.mrb[5].mxu0 }
 0x410   :  { %v315_v63 = vadd.f32 %v314_v61, %v2147_v57  ;;  %v316_v0 = vpop.f32.mrb[6].mxu0 }
 0x411   :  { %v325_v8 = vadd.f32 %v321_v60, %v313_v59  ;;  %v317_v9 = vpop.f32.mrb[7].mxu0 }
 0x412   :  { %v326_v10 = vadd.f32 %v322_v62, %v315_v63 }
 0x413   :  { %1786 = vtanh.f32 %v325_v8  ;;  %v1613_v15 = vmul.f32 -1.442695, %v325_v8 }
 0x414   :  { %1788 = vtanh.f32 %v326_v10  ;;  %v1614_v17 = vmul.f32 -1.442695, %v326_v10 }
 0x415   :  { %1790 = vpow2.f32 %v1613_v15 }
 0x416   :  { %1792 = vpow2.f32 %v1614_v17 }
 0x41d   :  { %v1787_v11 = vpop.eup %1786 }
 0x41e   :  { %v1789_v12 = vpop.eup %1788  ;;  %336 = vrot.lane.b32.xlu0 %v1787_v11, %s1954_s29 }
 0x41f   :  { %364 = vrot.lane.b32.xlu1 %v1789_v12, %s1954_s29  ;;  %v1791_v19 = vpop.eup %1790 }
 0x420   :  { %v1793_v20 = vpop.eup %1792  ;;  %v330_v21 = vadd.f32 1.0, %v1791_v19 }
 0x421   :  { %v354_v22 = vadd.f32 1.0, %v1793_v20 }
 0x422   :  { %359 = vrot.lane.b32.xlu0 %v1601_v13, %s1954_s29  ;;  %1794 = vrcp.f32 %v330_v21 }
 0x423   :  { %1796 = vrcp.f32 %v354_v22 }
 0x42c   :  { %v1795_v25 = vpop.eup %1794 }
 0x42d   :  { %v1797_v27 = vpop.eup %1796  ;;  %v334_v33 = vmul.f32 %v1795_v25, %v2122_v46 }
 0x490   :  { %v337_v26 = vpop.permute.xlu0 %336 }
 0x491   :  { %v339_v28 = vmul.f32 %v1795_v25, %v337_v26  ;;  %v365_v30 = vpop.permute.xlu1 %364 }
 0x492   :  { %v367_v31 = vmul.f32 %v1797_v27, %v365_v30 }
 0x493   :  { %341 = vrot.lane.b32.xlu1 %v339_v28, %s1954_s29 }
 0x494   :  { %369 = vrot.lane.b32.xlu0 %v367_v31, %s1954_s29  ;;  %v360_v32 = vpop.permute.xlu0 %359 }
 0x495   :  { %v362_v34 = vmul.f32 %v1797_v27, %v360_v32 }
 0x505   :  { %v342_v35 = vpop.permute.xlu1 %341 }
 0x506   :  { %v2162_v36 = vadd.f32 %v342_v35, %v334_v33  ;;  %v370_v37 = vpop.permute.xlu0 %369 }
 0x507   :  { %v2164_v38 = vadd.f32 %v370_v37, %v362_v34 }
 0x508   :  { %1798 = vtanh.f32 %v2162_v36 }
 0x509   :  { %1800 = vtanh.f32 %v2164_v38 }
 0x512   :  { %v1799_v39 = vpop.eup %1798 }
 0x513   :  { %v1801_v40 = vpop.eup %1800  ;;  %347 = vrot.lane.b32.xlu1 %v1799_v39, %s1954_s29 }
 0x514   :  { %375 = vrot.lane.b32.xlu0 %v1801_v40, %s1954_s29 }
 0x585   :  { %v348_v41 = vpop.permute.xlu1 %347 }
 0x586   :  { %v350_v42 = vmul.f32 %v1795_v25, %v348_v41  ;;  %v376_v43 = vpop.permute.xlu0 %375 }
 0x587   :  { %v378_v44 = vmul.f32 %v1797_v27, %v376_v43  ;;  %v541_v43 = vrot.slane %v2109_v23, 6 }
 0x588   :  { %380 = vrot.lane.b32.xlu1 %v350_v42, %s1957_s19 }
 0x589   :  { %384 = vrot.lane.b32.xlu0 %v378_v44, %s1958_s1 }
 0x5fa   :  { %v381_v45 = vpop.permute.xlu1 %380 }
 0x5fb   :  { %v385_v46 = vpop.permute.xlu0 %384 }
 0x5fc   :  { %v387_v47 = vsel %vm142_vm1, %v381_v45, %v385_v46  ;;  %v542_v45 = vrot.slane %v2111_v24, 6 }
 0x5fd   :  { %v388_v48 = vpack.c.bf16 %v387_v47, %v387_v47 }
 0x5ff   :  { %1615 = vmatmul.mubr.msk.bf16.vlgmr.msra.gmra.mrb[4].mxu1 %vm196_vm2, %v388_v48 }
 0x600   :  { %609 = vmatpush1.bf16.msra.mxu1 %v2022_v2  ;;  %640 = vmatprep.mubr.bf16.mxu1 %v1955_v4 }
 0x601   :  { %610 = vmatprep.subr.bf16.mxu1 %v2027_v3 }
 0x604   :  { %611 = vmatpush1.bf16.msra.mxu1 %v2036_v6 }
 0x605   :  { %612 = vmatprep.subr.bf16.mxu1 %v2042_v7 }
 0x608   :  { %613 = vmatpush1.bf16.msra.mxu1 %v2063_v14 }
 0x609   :  { %614 = vmatprep.subr.bf16.mxu1 %v2070_v16 }
 0x60c   :  { %615 = vmatpush1.bf16.msra.mxu1 %v2080_v18 }
 0x60d   :  { %822 = vmatprep.subr.bf16.mxu1 %v2017_v1 }
 0x6d2   :  { %v426_v49 = vpop.f32.mrb[4].mxu1 }
 0x6d3   :  { %v427_v50 = vadd.f32 %v426_v49, %v2116_v29  ;;  %v428_v54 = vpop.f32.mrb[5].mxu1 }
 0x6d4   :  { %v429_v56 = vadd.f32 %v428_v54, %v2147_v57  ;;  %v430_v58 = vpop.f32.mrb[6].mxu1 }
 0x6d5   :  { %v437_v59 = vadd.f32 %v433_v53, %v427_v50  ;;  %v431_v60 = vpop.f32.mrb[7].mxu1 }
 0x6d6   :  { %v438_v61 = vadd.f32 %v434_v55, %v429_v56 }
 0x6d7   :  { %1802 = vtanh.f32 %v437_v59  ;;  %v1616_v0 = vmul.f32 -1.442695, %v437_v59 }
 0x6d8   :  { %1804 = vtanh.f32 %v438_v61  ;;  %v1617_v8 = vmul.f32 -1.442695, %v438_v61 }
 0x6d9   :  { %1806 = vpow2.f32 %v1616_v0 }
 0x6da   :  { %1808 = vpow2.f32 %v1617_v8 }
 0x6e1   :  { %v1803_v62 = vpop.eup %1802 }
 0x6e2   :  { %v1805_v63 = vpop.eup %1804  ;;  %448 = vrot.lane.b32.xlu1 %v1803_v62, %s1954_s29 }
 0x6e3   :  { %472 = vrot.lane.b32.xlu0 %v1805_v63, %s1954_s29  ;;  %v1807_v9 = vpop.eup %1806 }
 0x6e4   :  { %v1809_v10 = vpop.eup %1808  ;;  %v442_v11 = vadd.f32 1.0, %v1807_v9 }
 0x6e5   :  { %v466_v12 = vadd.f32 1.0, %v1809_v10 }
 0x6e6   :  { %1810 = vrcp.f32 %v442_v11 }
 0x6e7   :  { %1812 = vrcp.f32 %v466_v12 }
 0x6f0   :  { %v1811_v13 = vpop.eup %1810 }
 0x6f1   :  { %v1813_v17 = vpop.eup %1812  ;;  %v446_v22 = vmul.f32 %v1811_v13, %v2162_v36 }
 0x6f2   :  { %v470_v26 = vmul.f32 %v1813_v17, %v2164_v38 }
 0x754   :  { %v449_v15 = vpop.permute.xlu1 %448 }
 0x755   :  { %v451_v19 = vmul.f32 %v1811_v13, %v449_v15  ;;  %v473_v20 = vpop.permute.xlu0 %472 }
 0x756   :  { %v475_v21 = vmul.f32 %v1813_v17, %v473_v20 }
 0x757   :  { %453 = vrot.lane.b32.xlu1 %v451_v19, %s1954_s29 }
 0x758   :  { %477 = vrot.lane.b32.xlu0 %v475_v21, %s1954_s29 }
 0x7c9   :  { %v454_v25 = vpop.permute.xlu1 %453 }
 0x7ca   :  { %v2193_v27 = vadd.f32 %v454_v25, %v446_v22  ;;  %v478_v28 = vpop.permute.xlu0 %477 }
 0x7cb   :  { %v2195_v30 = vadd.f32 %v478_v28, %v470_v26 }
 0x7cc   :  { %1814 = vtanh.f32 %v2193_v27 }
 0x7cd   :  { %1816 = vtanh.f32 %v2195_v30 }
 0x7d6   :  { %v1815_v31 = vpop.eup %1814 }
 0x7d7   :  { %v1817_v32 = vpop.eup %1816  ;;  %459 = vrot.lane.b32.xlu1 %v1815_v31, %s1954_s29 }
 0x7d8   :  { %483 = vrot.lane.b32.xlu0 %v1817_v32, %s1954_s29 }
 0x849   :  { %v460_v33 = vpop.permute.xlu1 %459 }
 0x84a   :  { %v462_v34 = vmul.f32 %v1811_v13, %v460_v33  ;;  %v484_v35 = vpop.permute.xlu0 %483 }
 0x84b   :  { %v486_v36 = vmul.f32 %v1813_v17, %v484_v35 }
 0x84c   :  { %488 = vrot.lane.b32.xlu1 %v462_v34, %s1957_s19 }
 0x84d   :  { %492 = vrot.lane.b32.xlu0 %v486_v36, %s1958_s1 }
 0x8be   :  { %v489_v37 = vpop.permute.xlu1 %488 }
 0x8bf   :  { %v493_v38 = vpop.permute.xlu0 %492 }
 0x8c0   :  { %v495_v39 = vsel %vm142_vm1, %v489_v37, %v493_v38 }
 0x8c1   :  { %v496_v40 = vpack.c.bf16 %v495_v39, %v495_v39 }
 0x8c3   :  { %1618 = vmatmul.mubr.msk.bf16.vlgmr.msra.gmra.mrb[8].mxu0 %vm196_vm2, %v496_v40 }
 0x8c4   :  { %713 = vmatpush1.bf16.msra.mxu0 %v2022_v2  ;;  %744 = vmatprep.mubr.bf16.mxu0 %v1955_v4 }
 0x8c5   :  { %714 = vmatprep.subr.bf16.mxu0 %v2027_v3 }
 0x8c8   :  { %715 = vmatpush1.bf16.msra.mxu0 %v2036_v6 }
 0x8c9   :  { %716 = vmatprep.subr.bf16.mxu0 %v2042_v7 }
 0x8cc   :  { %717 = vmatpush1.bf16.msra.mxu0 %v2063_v14 }
 0x8cd   :  { %718 = vmatprep.subr.bf16.mxu0 %v2070_v16 }
 0x8d0   :  { %719 = vmatpush1.bf16.msra.mxu0 %v2080_v18 }
 0x8d1   :  { %930 = vmatprep.subr.bf16.mxu0 %v2017_v1 }
 0x996   :  { %v534_v41 = vpop.f32.mrb[8].mxu0 }
 0x997   :  { %v535_v42 = vadd.f32 %v534_v41, %v2116_v29  ;;  %v536_v44 = vpop.f32.mrb[9].mxu0 }
 0x998   :  { %v537_v46 = vadd.f32 %v536_v44, %v2147_v57  ;;  %v538_v47 = vpop.f32.mrb[10].mxu0 }
 0x999   :  { %v545_v48 = vadd.f32 %v541_v43, %v535_v42  ;;  %v539_v49 = vpop.f32.mrb[11].mxu0 }
 0x99a   :  { %v546_v50 = vadd.f32 %v542_v45, %v537_v46 }
 0x99b   :  { %1818 = vtanh.f32 %v545_v48  ;;  %v1619_v55 = vmul.f32 -1.442695, %v545_v48 }
 0x99c   :  { %1820 = vtanh.f32 %v546_v50  ;;  %v1620_v56 = vmul.f32 -1.442695, %v546_v50 }
 0x99d   :  { %1822 = vpow2.f32 %v1619_v55 }
 0x99e   :  { %1824 = vpow2.f32 %v1620_v56 }
 0x9a5   :  { %v1819_v53 = vpop.eup %1818 }
 0x9a6   :  { %v1821_v54 = vpop.eup %1820  ;;  %556 = vrot.lane.b32.xlu1 %v1819_v53, %s1954_s29 }
 0x9a7   :  { %580 = vrot.lane.b32.xlu0 %v1821_v54, %s1954_s29  ;;  %v1823_v23 = vpop.eup %1822 }
 0x9a8   :  { %v1825_v24 = vpop.eup %1824  ;;  %v550_v58 = vadd.f32 1.0, %v1823_v23 }
 0x9a9   :  { %v574_v59 = vadd.f32 1.0, %v1825_v24 }
 0x9aa   :  { %1826 = vrcp.f32 %v550_v58 }
 0x9ab   :  { %1828 = vrcp.f32 %v574_v59 }
 0x9b4   :  { %v1827_v60 = vpop.eup %1826 }
 0x9b5   :  { %v1829_v62 = vpop.eup %1828  ;;  %v554_v9 = vmul.f32 %v1827_v60, %v2193_v27 }
 0x9b6   :  { %v578_v11 = vmul.f32 %v1829_v62, %v2195_v30 }
 0xa18   :  { %v557_v61 = vpop.permute.xlu1 %556 }
 0xa19   :  { %v559_v63 = vmul.f32 %v1827_v60, %v557_v61  ;;  %v581_v0 = vpop.permute.xlu0 %580 }
 0xa1a   :  { %v583_v8 = vmul.f32 %v1829_v62, %v581_v0 }
 0xa1b   :  { %561 = vrot.lane.b32.xlu1 %v559_v63, %s1954_s29 }
 0xa1c   :  { %585 = vrot.lane.b32.xlu0 %v583_v8, %s1954_s29 }
 0xa8d   :  { %v562_v10 = vpop.permute.xlu1 %561 }
 0xa8e   :  { %v564_v12 = vadd.f32 %v562_v10, %v554_v9  ;;  %v586_v13 = vpop.permute.xlu0 %585 }
 0xa8f   :  { %v588_v15 = vadd.f32 %v586_v13, %v578_v11 }
 0xa90   :  { %1830 = vtanh.f32 %v564_v12 }
 0xa91   :  { %1832 = vtanh.f32 %v588_v15 }
 0xa9a   :  { %v1831_v17 = vpop.eup %1830 }
 0xa9b   :  { %v1833_v19 = vpop.eup %1832  ;;  %567 = vrot.lane.b32.xlu1 %v1831_v17, %s1954_s29 }
 0xa9c   :  { %591 = vrot.lane.b32.xlu0 %v1833_v19, %s1954_s29 }
 0xb0d   :  { %v568_v20 = vpop.permute.xlu1 %567 }
 0xb0e   :  { %v570_v21 = vmul.f32 %v1827_v60, %v568_v20  ;;  %v592_v22 = vpop.permute.xlu0 %591  ;;  %v756_v20 = vrot.slane %v2134_v52, 2 }
 0xb0f   :  { %v594_v25 = vmul.f32 %v1829_v62, %v592_v22 }
 0xb10   :  { %596 = vrot.lane.b32.xlu1 %v570_v21, %s1957_s19 }
 0xb11   :  { %600 = vrot.lane.b32.xlu0 %v594_v25, %s1958_s1 }
 0xb82   :  { %v597_v26 = vpop.permute.xlu1 %596 }
 0xb83   :  { %v601_v27 = vpop.permute.xlu0 %600 }
 0xb84   :  { %v603_v28 = vsel %vm142_vm1, %v597_v26, %v601_v27 }
 0xb85   :  { %v604_v30 = vpack.c.bf16 %v603_v28, %v603_v28 }
 0xb87   :  { %1621 = vmatmul.mubr.msk.bf16.vlgmr.msra.gmra.mrb[8].mxu1 %vm196_vm2, %v604_v30 }
 0xb88   :  { %823 = vmatpush1.bf16.msra.mxu1 %v2022_v2  ;;  %854 = vmatprep.mubr.bf16.mxu1 %v1955_v4 }
 0xb89   :  { %824 = vmatprep.subr.bf16.mxu1 %v2027_v3 }
 0xb8c   :  { %825 = vmatpush1.bf16.msra.mxu1 %v2036_v6 }
 0xb8d   :  { %826 = vmatprep.subr.bf16.mxu1 %v2042_v7 }
 0xb90   :  { %827 = vmatpush1.bf16.msra.mxu1 %v2063_v14 }
 0xb91   :  { %828 = vmatprep.subr.bf16.mxu1 %v2070_v16 }
 0xb94   :  { %829 = vmatpush1.bf16.msra.mxu1 %v2080_v18 }
 0xb95   :  { %1038 = vmatprep.subr.bf16.mxu1 %v2017_v1 }
 0xc5a   :  { %v642_v31 = vpop.f32.mrb[8].mxu1 }
 0xc5b   :  { %v643_v32 = vadd.f32 %v642_v31, %v2116_v29  ;;  %v644_v33 = vpop.f32.mrb[9].mxu1 }
 0xc5c   :  { %v645_v34 = vadd.f32 %v644_v33, %v2147_v57  ;;  %v646_v35 = vpop.f32.mrb[10].mxu1 }
 0xc5d   :  { %v649_v36 = vadd.f32 %v643_v32, %v2132_v51  ;;  %v647_v37 = vpop.f32.mrb[11].mxu1 }
 0xc5e   :  { %v650_v38 = vadd.f32 %v645_v34, %v2134_v52 }
 0xc5f   :  { %1834 = vtanh.f32 %v649_v36  ;;  %v1622_v1 = vmul.f32 -1.442695, %v649_v36 }
 0xc60   :  { %1836 = vtanh.f32 %v650_v38  ;;  %v1623_v41 = vmul.f32 -1.442695, %v650_v38 }
 0xc61   :  { %1838 = vpow2.f32 %v1622_v1 }
 0xc62   :  { %1840 = vpow2.f32 %v1623_v41 }
 0xc69   :  { %v1835_v39 = vpop.eup %1834 }
 0xc6a   :  { %v1837_v40 = vpop.eup %1836  ;;  %660 = vrot.lane.b32.xlu1 %v1835_v39, %s1954_s29 }
 0xc6b   :  { %684 = vrot.lane.b32.xlu0 %v1837_v40, %s1954_s29  ;;  %v1839_v42 = vpop.eup %1838 }
 0xc6c   :  { %v1841_v43 = vpop.eup %1840  ;;  %v654_v44 = vadd.f32 1.0, %v1839_v42 }
 0xc6d   :  { %v678_v45 = vadd.f32 1.0, %v1841_v43 }
 0xc6e   :  { %1842 = vrcp.f32 %v654_v44 }
 0xc6f   :  { %1844 = vrcp.f32 %v678_v45 }
 0xc78   :  { %v1843_v46 = vpop.eup %1842 }
 0xc79   :  { %v1845_v48 = vpop.eup %1844  ;;  %v658_v54 = vmul.f32 %v1843_v46, %v564_v12 }
 0xc7a   :  { %v682_v56 = vmul.f32 %v1845_v48, %v588_v15  ;;  %v755_v15 = vrot.slane %v2132_v51, 2 }
 0xcdc   :  { %v661_v47 = vpop.permute.xlu1 %660 }
 0xcdd   :  { %v663_v49 = vmul.f32 %v1843_v46, %v661_v47  ;;  %v685_v50 = vpop.permute.xlu0 %684 }
 0xcde   :  { %v687_v53 = vmul.f32 %v1845_v48, %v685_v50 }
 0xcdf   :  { %665 = vrot.lane.b32.xlu1 %v663_v49, %s1954_s29 }
 0xce0   :  { %689 = vrot.lane.b32.xlu0 %v687_v53, %s1954_s29 }
 0xd51   :  { %v666_v55 = vpop.permute.xlu1 %665 }
 0xd52   :  { %v668_v23 = vadd.f32 %v666_v55, %v658_v54  ;;  %v690_v24 = vpop.permute.xlu0 %689 }
 0xd53   :  { %v692_v58 = vadd.f32 %v690_v24, %v682_v56 }
 0xd54   :  { %1846 = vtanh.f32 %v668_v23 }
 0xd55   :  { %1848 = vtanh.f32 %v692_v58 }
 0xd5e   :  { %v1847_v59 = vpop.eup %1846 }
 0xd5f   :  { %v1849_v60 = vpop.eup %1848  ;;  %671 = vrot.lane.b32.xlu1 %v1847_v59, %s1954_s29 }
 0xd60   :  { %695 = vrot.lane.b32.xlu0 %v1849_v60, %s1954_s29  ;;  %v863_v60 = vrot.slane %v2132_v51, 4 }
 0xdd1   :  { %v672_v61 = vpop.permute.xlu1 %671 }
 0xdd2   :  { %v674_v62 = vmul.f32 %v1843_v46, %v672_v61  ;;  %v696_v63 = vpop.permute.xlu0 %695 }
 0xdd3   :  { %v698_v0 = vmul.f32 %v1845_v48, %v696_v63 }
 0xdd4   :  { %700 = vrot.lane.b32.xlu1 %v674_v62, %s1957_s19 }
 0xdd5   :  { %704 = vrot.lane.b32.xlu0 %v698_v0, %s1958_s1 }
 0xe46   :  { %v701_v8 = vpop.permute.xlu1 %700 }
 0xe47   :  { %v705_v9 = vpop.permute.xlu0 %704 }
 0xe48   :  { %v707_v10 = vsel %vm142_vm1, %v701_v8, %v705_v9 }
 0xe49   :  { %v708_v11 = vpack.c.bf16 %v707_v10, %v707_v10 }
 0xe4b   :  { %1624 = vmatmul.mubr.msk.bf16.vlgmr.msra.gmra.mrb[12].mxu0 %vm196_vm2, %v708_v11 }
 0xe4c   :  { %931 = vmatpush1.bf16.msra.mxu0 %v2022_v2  ;;  %962 = vmatprep.mubr.bf16.mxu0 %v1955_v4 }
 0xe4d   :  { %932 = vmatprep.subr.bf16.mxu0 %v2027_v3 }
 0xe50   :  { %933 = vmatpush1.bf16.msra.mxu0 %v2036_v6 }
 0xe51   :  { %934 = vmatprep.subr.bf16.mxu0 %v2042_v7 }
 0xe54   :  { %935 = vmatpush1.bf16.msra.mxu0 %v2063_v14 }
 0xe55   :  { %936 = vmatprep.subr.bf16.mxu0 %v2070_v16 }
 0xe58   :  { %937 = vmatpush1.bf16.msra.mxu0 %v2080_v18 }
 0xf1e   :  { %v746_v12 = vpop.f32.mrb[12].mxu0 }
 0xf1f   :  { %v747_v13 = vadd.f32 %v746_v12, %v2116_v29  ;;  %v748_v17 = vpop.f32.mrb[13].mxu0 }
 0xf20   :  { %v749_v19 = vadd.f32 %v748_v17, %v2147_v57  ;;  %v750_v21 = vpop.f32.mrb[14].mxu0 }
 0xf21   :  { %v759_v22 = vadd.f32 %v755_v15, %v747_v13  ;;  %v751_v25 = vpop.f32.mrb[15].mxu0 }
 0xf22   :  { %v760_v26 = vadd.f32 %v756_v20, %v749_v19 }
 0xf23   :  { %1850 = vtanh.f32 %v759_v22  ;;  %v1625_v30 = vmul.f32 -1.442695, %v759_v22 }
 0xf24   :  { %1852 = vtanh.f32 %v760_v26  ;;  %v1626_v31 = vmul.f32 -1.442695, %v760_v26 }
 0xf25   :  { %1854 = vpow2.f32 %v1625_v30 }
 0xf26   :  { %1856 = vpow2.f32 %v1626_v31 }
 0xf2d   :  { %v1851_v27 = vpop.eup %1850 }
 0xf2e   :  { %v1853_v28 = vpop.eup %1852  ;;  %770 = vrot.lane.b32.xlu1 %v1851_v27, %s1954_s29 }
 0xf2f   :  { %794 = vrot.lane.b32.xlu0 %v1853_v28, %s1954_s29  ;;  %v1855_v32 = vpop.eup %1854 }
 0xf30   :  { %v1857_v33 = vpop.eup %1856  ;;  %v764_v34 = vadd.f32 1.0, %v1855_v32 }
 0xf31   :  { %v788_v35 = vadd.f32 1.0, %v1857_v33 }
 0xf32   :  { %1858 = vrcp.f32 %v764_v34 }
 0xf33   :  { %1860 = vrcp.f32 %v788_v35 }
 0xf3c   :  { %v1859_v36 = vpop.eup %1858 }
 0xf3d   :  { %v1861_v38 = vpop.eup %1860  ;;  %v768_v41 = vmul.f32 %v1859_v36, %v668_v23 }
 0xf3e   :  { %v792_v43 = vmul.f32 %v1861_v38, %v692_v58 }
 0xfa0   :  { %v771_v37 = vpop.permute.xlu1 %770 }
 0xfa1   :  { %v773_v39 = vmul.f32 %v1859_v36, %v771_v37  ;;  %v795_v40 = vpop.permute.xlu0 %794 }
 0xfa2   :  { %v797_v1 = vmul.f32 %v1861_v38, %v795_v40 }
 0xfa3   :  { %775 = vrot.lane.b32.xlu1 %v773_v39, %s1954_s29 }
 0xfa4   :  { %799 = vrot.lane.b32.xlu0 %v797_v1, %s1954_s29  ;;  %v971_v1 = vrot.slane %v2132_v51, 6 }
0x1015   :  { %v776_v42 = vpop.permute.xlu1 %775 }
0x1016   :  { %v778_v44 = vadd.f32 %v776_v42, %v768_v41  ;;  %v800_v45 = vpop.permute.xlu0 %799 }
0x1017   :  { %v802_v46 = vadd.f32 %v800_v45, %v792_v43  ;;  %v972_v43 = vrot.slane %v2134_v52, 6 }
0x1018   :  { %1862 = vtanh.f32 %v778_v44 }
0x1019   :  { %1864 = vtanh.f32 %v802_v46 }
0x1022   :  { %v1863_v47 = vpop.eup %1862 }
0x1023   :  { %v1865_v48 = vpop.eup %1864  ;;  %781 = vrot.lane.b32.xlu1 %v1863_v47, %s1954_s29 }
0x1024   :  { %805 = vrot.lane.b32.xlu0 %v1865_v48, %s1954_s29 }
0x1095   :  { %v782_v49 = vpop.permute.xlu1 %781 }
0x1096   :  { %v784_v50 = vmul.f32 %v1859_v36, %v782_v49  ;;  %v806_v53 = vpop.permute.xlu0 %805 }
0x1097   :  { %v808_v54 = vmul.f32 %v1861_v38, %v806_v53 }
0x1098   :  { %810 = vrot.lane.b32.xlu1 %v784_v50, %s1957_s19 }
0x1099   :  { %814 = vrot.lane.b32.xlu0 %v808_v54, %s1958_s1 }
0x110a   :  { %v811_v55 = vpop.permute.xlu1 %810 }
0x110b   :  { %v815_v56 = vpop.permute.xlu0 %814 }
0x110c   :  { %v817_v23 = vsel %vm142_vm1, %v811_v55, %v815_v56 }
0x110d   :  { %v818_v24 = vpack.c.bf16 %v817_v23, %v817_v23 }
0x110f   :  { %1627 = vmatmul.mubr.msk.bf16.vlgmr.msra.gmra.mrb[12].mxu1 %vm196_vm2, %v818_v24 }
0x1110   :  { %1039 = vmatpush1.bf16.msra.mxu1 %v2022_v2  ;;  %1070 = vmatprep.mubr.bf16.mxu1 %v1955_v4 }
0x1111   :  { %1040 = vmatprep.subr.bf16.mxu1 %v2027_v3  ;;  %v864_v3 = vrot.slane %v2134_v52, 4 }
0x1114   :  { %1041 = vmatpush1.bf16.msra.mxu1 %v2036_v6 }
0x1115   :  { %1042 = vmatprep.subr.bf16.mxu1 %v2042_v7 }
0x1118   :  { %1043 = vmatpush1.bf16.msra.mxu1 %v2063_v14 }
0x1119   :  { %1044 = vmatprep.subr.bf16.mxu1 %v2070_v16 }
0x111c   :  { %1045 = vmatpush1.bf16.msra.mxu1 %v2080_v18 }
0x11e2   :  { %v856_v58 = vpop.f32.mrb[12].mxu1 }
0x11e3   :  { %v857_v59 = vadd.f32 %v856_v58, %v2116_v29  ;;  %v858_v2 = vpop.f32.mrb[13].mxu1 }
0x11e4   :  { %v859_v4 = vadd.f32 %v858_v2, %v2147_v57  ;;  %v860_v61 = vpop.f32.mrb[14].mxu1 }
0x11e5   :  { %v867_v6 = vadd.f32 %v863_v60, %v857_v59  ;;  %v861_v62 = vpop.f32.mrb[15].mxu1 }
0x11e6   :  { %v868_v7 = vadd.f32 %v864_v3, %v859_v4 }
0x11e7   :  { %1866 = vtanh.f32 %v867_v6  ;;  %v1628_v18 = vmul.f32 -1.442695, %v867_v6 }
0x11e8   :  { %1868 = vtanh.f32 %v868_v7  ;;  %v1629_v63 = vmul.f32 -1.442695, %v868_v7 }
0x11e9   :  { %1870 = vpow2.f32 %v1628_v18  ;;  %v1959_v18 = vmov 0.0|0.0  }
0x11ea   :  { %1872 = vpow2.f32 %v1629_v63  ;;  %1727 = vmatprep.subr.bf16.mxu0 %v1959_v18  ;;  %1737 = vmatprep.subr.bf16.mxu1 %v1959_v18 }
0x11f1   :  { %v1867_v14 = vpop.eup %1866 }
0x11f2   :  { %v1869_v16 = vpop.eup %1868  ;;  %878 = vrot.lane.b32.xlu1 %v1867_v14, %s1954_s29  ;;  %v1123_v14 = vld [vmem:[%s2465_s5] sm:$0xff] }
0x11f3   :  { %902 = vrot.lane.b32.xlu0 %v1869_v16, %s1954_s29  ;;  %v1871_v0 = vpop.eup %1870  ;;  %v1124_v16 = vld [vmem:[%s2465_s5 + $0x8] sm:$0xf] }
0x11f4   :  { %v1873_v8 = vpop.eup %1872  ;;  %v872_v9 = vadd.f32 1.0, %v1871_v0  ;;  %v1728_v63 = vpack.c.bf16 %v1124_v16, %v1123_v14  ;;  %v1122_v0 = vld [vmem:[%s2462_s2] sm:$0x3]  ;;  %v1407_v16 = vld [vmem:[%s2466_s6 + $0x10] sm:$0xff] }
0x11f5   :  { %v896_v10 = vadd.f32 1.0, %v1873_v8 }
0x11f6   :  { %1874 = vrcp.f32 %v872_v9 }
0x11f7   :  { %1876 = vrcp.f32 %v896_v10 }
0x1200   :  { %v1875_v11 = vpop.eup %1874 }
0x1201   :  { %v1877_v13 = vpop.eup %1876  ;;  %v876_v20 = vmul.f32 %v1875_v11, %v778_v44 }
0x1202   :  { %v900_v22 = vmul.f32 %v1877_v13, %v802_v46 }
0x1264   :  { %v879_v12 = vpop.permute.xlu1 %878 }
0x1265   :  { %v881_v15 = vmul.f32 %v1875_v11, %v879_v12  ;;  %v903_v17 = vpop.permute.xlu0 %902 }
0x1266   :  { %v905_v19 = vmul.f32 %v1877_v13, %v903_v17 }
0x1267   :  { %883 = vrot.lane.b32.xlu1 %v881_v15, %s1954_s29 }
0x1268   :  { %907 = vrot.lane.b32.xlu0 %v905_v19, %s1954_s29  ;;  %v1211_v19 = vld [vmem:[%s2465_s5 + $0xd] sm:$0xff] }
0x12d9   :  { %v884_v21 = vpop.permute.xlu1 %883 }
0x12da   :  { %v886_v25 = vadd.f32 %v884_v21, %v876_v20  ;;  %v908_v26 = vpop.permute.xlu0 %907  ;;  %v1212_v20 = vld [vmem:[%s2465_s5 + $0x15] sm:$0xff]  ;;  %v1635_v21 = vld [vmem:[%s2465_s5 + $0xc] ss:$0 sm:$0xff] }
0x12db   :  { %v910_v27 = vadd.f32 %v908_v26, %v900_v22 }
0x12dc   :  { %1878 = vtanh.f32 %v886_v25 }
0x12dd   :  { %1880 = vtanh.f32 %v910_v27 }
0x12e6   :  { %v1879_v28 = vpop.eup %1878 }
0x12e7   :  { %v1881_v30 = vpop.eup %1880  ;;  %889 = vrot.lane.b32.xlu1 %v1879_v28, %s1954_s29  ;;  %v1214_v28 = vld [vmem:[%s2465_s5 + $0x25] sm:$0xff] }
0x12e8   :  { %913 = vrot.lane.b32.xlu0 %v1881_v30, %s1954_s29 }
0x1359   :  { %v890_v31 = vpop.permute.xlu1 %889 }
0x135a   :  { %v892_v32 = vmul.f32 %v1875_v11, %v890_v31  ;;  %v914_v33 = vpop.permute.xlu0 %913 }
0x135b   :  { %v916_v34 = vmul.f32 %v1877_v13, %v914_v33 }
0x135c   :  { %918 = vrot.lane.b32.xlu1 %v892_v32, %s1957_s19 }
0x135d   :  { %922 = vrot.lane.b32.xlu0 %v916_v34, %s1958_s1 }
0x13ce   :  { %v919_v35 = vpop.permute.xlu1 %918 }
0x13cf   :  { %v923_v36 = vpop.permute.xlu0 %922 }
0x13d0   :  { %v925_v37 = vsel %vm142_vm1, %v919_v35, %v923_v36 }
0x13d1   :  { %v926_v38 = vpack.c.bf16 %v925_v37, %v925_v37 }
0x13d3   :  { %1630 = vmatmul.mubr.msk.bf16.vlgmr.msra.gmra.mrb[16].mxu0 %vm196_vm2, %v926_v38 }
0x13d4   :  { %1676 = vmatprep.mubr.msk.f32.mxu0 %vm1961_vm6, %v1956_v5  ;;  %1730 = vmatpush3.bf16.msk.msra.mxu0 %vm1729_vm5, %v1728_v63  ;;  %v1408_v63 = vld [vmem:[%s2466_s6 + $0x18] sm:$0xff] }
0x13d5   :  { %1731 = vmatprep.subr.bf16.mxu0 %v1959_v18 }
0x13db   :  { %1677 = vmatmul.mubr.msk.f32.vlgmr.msra.gmra.mrb[20].mxu0 %vm1130_vm7, %v1122_v0 }
0x13dc   :  { %1687 = vmatprep.mubr.msk.f32.mxu0 %vm1961_vm6, %v1956_v5 }
0x14a6   :  { %v964_v39 = vpop.f32.mrb[16].mxu0 }
0x14a7   :  { %v965_v40 = vadd.f32 %v964_v39, %v2116_v29  ;;  %v966_v41 = vpop.f32.mrb[17].mxu0 }
0x14a8   :  { %v967_v42 = vadd.f32 %v966_v41, %v2147_v57  ;;  %v968_v44 = vpop.f32.mrb[18].mxu0 }
0x14a9   :  { %v975_v45 = vadd.f32 %v971_v1, %v965_v40  ;;  %v969_v46 = vpop.f32.mrb[19].mxu0  ;;  %v1308_v44 = vld [vmem:[%s2465_s5 + $0x30] sm:$0xff] }
0x14aa   :  { %v976_v47 = vadd.f32 %v972_v43, %v967_v42  ;;  %v1638_v42 = vld [vmem:[%s2465_s5 + $0x2d] ss:$0 sm:$0xff]  ;;  %v1309_v46 = vld [vmem:[%s2465_s5 + $0x38] sm:$0xff] }
0x14ab   :  { %1882 = vtanh.f32 %v975_v45  ;;  %v1631_v29 = vmul.f32 -1.442695, %v975_v45 }
0x14ac   :  { %1884 = vtanh.f32 %v976_v47  ;;  %v1632_v50 = vmul.f32 -1.442695, %v976_v47 }
0x14ad   :  { %1886 = vpow2.f32 %v1631_v29 }
0x14ae   :  { %1888 = vpow2.f32 %v1632_v50  ;;  %v1204_v22 = vpop.f32.mrb[20].mxu0 }
0x14af   :  { %v1205_v26 = vadd.f32 %v1635_v21, %v1204_v22  ;;  %v1678_v30 = vpop.f32.mrb[21].mxu0 }
0x14b1   :  { %v1209_v31 = vmul.f32 0.2, %v1205_v26  ;;  %vm1208_vm9 = vcmp.ge.f32.partialorder %v1205_v26, 0.0 }
0x14b3   :  { %v1210_v33 = vsel %vm1208_vm9, %v1205_v26, %v1209_v31 }
0x14b5   :  { %v1883_v48 = vpop.eup %1882 }
0x14b6   :  { %v1885_v49 = vpop.eup %1884  ;;  %986 = vrot.lane.b32.xlu1 %v1883_v48, %s1954_s29  ;;  %v1641_v48 = vld [vmem:[%s2465_s5 + $0x2f] ss:$0 sm:$0xff] }
0x14b7   :  { %1010 = vrot.lane.b32.xlu0 %v1885_v49, %s1954_s29  ;;  %v1887_v51 = vpop.eup %1886  ;;  %v1738_v49 = vpack.c.bf16 %v1309_v46, %v1308_v44 }
0x14b8   :  { %v1889_v53 = vpop.eup %1888  ;;  %v980_v54 = vadd.f32 1.0, %v1887_v51 }
0x14b9   :  { %v1004_v52 = vadd.f32 1.0, %v1889_v53 }
0x14ba   :  { %1890 = vrcp.f32 %v980_v54 }
0x14bb   :  { %1892 = vrcp.f32 %v1004_v52 }
0x14c4   :  { %v1891_v55 = vpop.eup %1890 }
0x14c5   :  { %v1893_v23 = vpop.eup %1892  ;;  %v984_v60 = vmul.f32 %v1891_v55, %v886_v25  ;;  %v1732_v25 = vpack.c.bf16 %v1212_v20, %v1211_v19 }
0x14c6   :  { %v1008_v4 = vmul.f32 %v1893_v23, %v910_v27  ;;  %v1213_v27 = vld [vmem:[%s2465_s5 + $0x1d] sm:$0xff] }
0x14c7   :  { %1733 = vmatpush3.bf16.msra.mxu0 %v1732_v25  ;;  %v1735_v32 = vpack.c.bf16 %v1214_v28, %v1213_v27 }
0x14c8   :  { %1734 = vmatprep.subr.bf16.mxu0 %v1959_v18 }
0x14cb   :  { %1736 = vmatpush3.bf16.msra.mxu0 %v1735_v32 }
0x14cc   :  { %1743 = vmatprep.subr.bf16.mxu0 %v1959_v18 }
0x14ce   :  { %1688 = vmatmul.mubr.msk.f32.vlgmr.msra.gmra.mrb[22].mxu0 %vm142_vm1, %v1210_v33 }
0x14cf   :  { %1709 = vmatprep.mubr.msk.f32.mxu0 %vm1961_vm6, %v1956_v5 }
0x1528   :  { %v987_v56 = vpop.permute.xlu1 %986 }
0x1529   :  { %v989_v24 = vmul.f32 %v1891_v55, %v987_v56  ;;  %v1011_v58 = vpop.permute.xlu0 %1010  ;;  %v1311_v56 = vld [vmem:[%s2465_s5 + $0x48] sm:$0xff] }
0x152a   :  { %v1013_v59 = vmul.f32 %v1893_v23, %v1011_v58 }
0x152b   :  { %991 = vrot.lane.b32.xlu1 %v989_v24, %s1954_s29 }
0x152c   :  { %1015 = vrot.lane.b32.xlu0 %v1013_v59, %s1954_s29 }
0x159d   :  { %v992_v2 = vpop.permute.xlu1 %991 }
0x159e   :  { %v2305_v3 = vadd.f32 %v992_v2, %v984_v60  ;;  %v1016_v61 = vpop.permute.xlu0 %1015  ;;  %v1409_v2 = vld [vmem:[%s2466_s6 + $0x20] sm:$0xff] }
0x159f   :  { %v2307_v6 = vadd.f32 %v1016_v61, %v1008_v4  ;;  %v1410_v4 = vld [vmem:[%s2466_s6 + $0x28] sm:$0xff]  ;;  %v1411_v61 = vld [vmem:[%s2466_s6 + $0x30] sm:$0xff] }
0x15a0   :  { %1894 = vtanh.f32 %v2305_v3 }
0x15a1   :  { %1896 = vtanh.f32 %v2307_v6  ;;  %v1289_v43 = vpop.f32.mrb[22].mxu0 }
0x15a2   :  { %v1290_v45 = vadd.f32 %v1638_v42, %v1289_v43  ;;  %v1689_v47 = vpop.f32.mrb[23].mxu0 }
0x15aa   :  { %v1895_v62 = vpop.eup %1894 }
0x15ab   :  { %v1897_v7 = vpop.eup %1896  ;;  %997 = vrot.lane.b32.xlu1 %v1895_v62, %s1954_s29  ;;  %v1744_v62 = vpack.c.bf16 %v1410_v4, %v1409_v2 }
0x15ac   :  { %1021 = vrot.lane.b32.xlu0 %v1897_v7, %s1954_s29  ;;  %v1406_v7 = vld [vmem:[%s2466_s6 + $0x8] sm:$0xff] }
0x15ad   :  { %1745 = vmatpush3.bf16.msra.mxu0 %v1744_v62 }
0x15ae   :  { %1746 = vmatprep.subr.bf16.mxu0 %v1959_v18 }
0x161d   :  { %v998_v8 = vpop.permute.xlu1 %997 }
0x161e   :  { %v1000_v9 = vmul.f32 %v1891_v55, %v998_v8  ;;  %v1022_v10 = vpop.permute.xlu0 %1021  ;;  %v1310_v55 = vld [vmem:[%s2465_s5 + $0x40] sm:$0xff]  ;;  %v1753_v8 = vpack.c.bf16 %v1408_v63, %v1407_v16 }
0x161f   :  { %v1024_v11 = vmul.f32 %v1893_v23, %v1022_v10  ;;  %v1741_v23 = vpack.c.bf16 %v1311_v56, %v1310_v55  ;;  %v1642_v10 = vld [vmem:[%s2465_s5 + $0x50] ss:$0 sm:$0xff] }
0x1620   :  { %1026 = vrot.lane.b32.xlu1 %v1000_v9, %s1957_s19 }
0x1621   :  { %1030 = vrot.lane.b32.xlu0 %v1024_v11, %s1958_s1 }
0x1692   :  { %v1027_v12 = vpop.permute.xlu1 %1026 }
0x1693   :  { %1103 = vst.msk [vmem:[#allocation4] sm:$0x3] %vm1102_vm8, %v1027_v12  ;;  %v1031_v13 = vpop.permute.xlu0 %1030 }
0x1694   :  { %v1033_v15 = vsel %vm142_vm1, %v1027_v12, %v1031_v13  ;;  %v1644_v12 = vld [vmem:[%s2465_s5 + $0x51] ss:$0 sm:$0xff] }
0x1695   :  { %v1034_v17 = vpack.c.bf16 %v1033_v15, %v1033_v15 }
0x1697   :  { %1633 = vmatmul.mubr.msk.bf16.vlgmr.msra.gmra.mrb[16].mxu1 %vm196_vm2, %v1034_v17 }
0x1698   :  { %1698 = vmatprep.mubr.msk.f32.mxu1 %vm1961_vm6, %v1956_v5  ;;  %1739 = vmatpush3.bf16.msra.mxu1 %v1738_v49 }
0x1699   :  { %1740 = vmatprep.subr.bf16.mxu1 %v1959_v18 }
0x169c   :  { %1742 = vmatpush3.bf16.msra.mxu1 %v1741_v23 }
0x169d   :  { %1749 = vmatprep.subr.bf16.mxu1 %v1959_v18 }
0x176a   :  { %v1072_v34 = vpop.f32.mrb[16].mxu1 }
0x176b   :  { %v1073_v35 = vpop.f32.mrb[17].mxu1 }
0x176c   :  { %v1074_v36 = vadd.f32 %v1073_v35, %v2147_v57  ;;  %v1075_v37 = vpop.f32.mrb[18].mxu1  ;;  %v1640_v57 = vld [vmem:[%s2465_s5 + $0x2e] ss:$0 sm:$0xff] }
0x176d   :  { %v1076_v38 = vpop.f32.mrb[19].mxu1  ;;  %v1298_v29 = vmul.f32 %v1640_v57, %v1290_v45 }
0x176e   :  { %1898 = vtanh.f32 %v1074_v36  ;;  %v1634_v40 = vmul.f32 -1.442695, %v1074_v36 }
0x176f   :  { %v1304_v50 = vadd.f32 %v1641_v48, %v1298_v29 }
0x1770   :  { %1900 = vpow2.f32 %v1634_v40 }
0x1771   :  { %v1306_v54 = vmul.f32 0.2, %v1304_v50  ;;  %vm1305_vm10 = vcmp.ge.f32.partialorder %v1304_v50, 0.0 }
0x1773   :  { %v1307_v24 = vsel %vm1305_vm10, %v1304_v50, %v1306_v54 }
0x1774   :  { %1699 = vmatmul.mubr.msk.f32.vlgmr.msra.gmra.mrb[20].mxu1 %vm142_vm1, %v1307_v24 }
0x1775   :  { %1720 = vmatprep.mubr.msk.f32.mxu1 %vm1961_vm6, %v1956_v5  ;;  %v1412_v5 = vld [vmem:[%s2466_s6 + $0x38] sm:$0xff] }
0x1776   :  { %v1747_v0 = vpack.c.bf16 %v1412_v5, %v1411_v61 }
0x1778   :  { %v1899_v39 = vpop.eup %1898  ;;  %1748 = vmatpush3.bf16.msra.mxu0 %v1747_v0 }
0x1779   :  { %1087 = vrot.lane.b32.xlu1 %v1899_v39, %s1954_s29 }
0x177a   :  { %v1901_v1 = vpop.eup %1900 }
0x177b   :  { %v1081_v41 = vadd.f32 1.0, %v1901_v1 }
0x177d   :  { %1902 = vrcp.f32 %v1081_v41 }
0x1787   :  { %v1903_v51 = vpop.eup %1902 }
0x1788   :  { %v1085_v58 = vmul.f32 %v1903_v51, %v2307_v6  ;;  %v1405_v6 = vld [vmem:[%s2466_s6] sm:$0xff] }
0x1789   :  { %v1750_v14 = vpack.c.bf16 %v1406_v7, %v1405_v6 }
0x178b   :  { %1751 = vmatpush3.bf16.msra.mxu1 %v1750_v14 }
0x178c   :  { %1752 = vmatprep.subr.bf16.mxu1 %v1959_v18  ;;  %v1645_v18 = vld [vmem:[%s2465_s5 + $0x52] ss:$0 sm:$0xff]  ;;  %s1962_s5 = smov [#allocation4]  }
0x178d   :  { %s1581_s25 = sshll.u32 %s1962_s5, 4  ;;  %s1582_s25 = int_to_ptr.vmem [resolvable:$true] %s1581_s25 }
0x178e   :  { %s1906_s26 = scalar_lea.vmem %s1582_s25, 128  ;;  %p1911_p1 = scmp.lt.s32.totalorder %s1582_s25, %s1582_s25 }
0x178f   :  { %1754 = vmatpush3.bf16.msra.mxu1 %v1753_v8  ;;  %p1907_p0 = scmp.ne.s32.totalorder %s1582_s25, %s1906_s26  ;;  %p1912_p2 = scmp.lt.s32.totalorder %s1906_s26, %s1906_s26 }
0x1791   :  { %p1913_p3 = por %p1912_p2, %p1911_p1 }
0x1793   :  { %p1914_p4 = pnand %p1913_p3, %p1907_p0 }
0x17eb   :  { %v1088_v53 = vpop.permute.xlu1 %1087 }
0x17ec   :  { %v1090_v52 = vmul.f32 %v1903_v51, %v1088_v53 }
0x17ee   :  { %1092 = vrot.lane.b32.xlu0 %v1090_v52, %s1954_s29 }
0x1847   :  { %v1386_v11 = vpop.f32.mrb[20].mxu1 }
0x1848   :  { %v1387_v13 = vadd.f32 %v1642_v10, %v1386_v11  ;;  %v1700_v15 = vpop.f32.mrb[21].mxu1 }
0x184a   :  { %v1395_v17 = vmul.f32 %v1644_v12, %v1387_v13 }
0x184c   :  { %v1401_v19 = vadd.f32 %v1645_v18, %v1395_v17 }
0x184e   :  { %v1403_v20 = vmul.f32 0.2, %v1401_v19  ;;  %vm1402_vm11 = vcmp.ge.f32.partialorder %v1401_v19, 0.0 }
0x1860   :  { %v1093_v59 = vpop.permute.xlu0 %1092 }
0x1861   :  { %v1095_v60 = vadd.f32 %v1093_v59, %v1085_v58 }
0x1863   :  { %1904 = vtanh.f32 %v1095_v60 }
0x186d   :  { %v1905_v9 = vpop.eup %1904 }
0x186e   :  { %1098 = vrot.lane.b32.xlu1 %v1905_v9, %s1954_s29 }
0x1872   :  { %1105 = vrot.lane.b32.xlu1 %v2305_v3, %s1958_s1  ;;  %v1404_v3 = vsel %vm1402_vm11, %v1401_v19, %v1403_v20 }
0x1873   :  { %1710 = vmatmul.mubr.msk.f32.vlgmr.msra.gmra.mrb[24].mxu0 %vm142_vm1, %v1404_v3 }
0x18e0   :  { %v1099_v21 = vpop.permute.xlu1 %1098 }
0x18e1   :  { %v1101_v22 = vmul.f32 %v1903_v51, %v1099_v21 }
0x18e3   :  { %1111 = vrot.lane.b32.xlu0 %v1101_v22, %s1957_s19 }
0x18e4   :  { %v1106_v25 = vpop.permute.xlu1 %1105 }
0x18e5   :  { %1109 = vst.msk [vmem:[#allocation4 + $0x4] sm:$0x3] %vm1102_vm8, %v1106_v25 }
0x18e7   :  { %1117 = vrot.lane.b32.xlu0 %v1095_v60, %s1958_s1 }
0x1946   :  { %v1482_v28 = vpop.f32.mrb[24].mxu0 }
0x1947   :  { %v1711_v30 = vpop.f32.mrb[25].mxu0 }
0x1955   :  { %v1112_v26 = vpop.permute.xlu0 %1111 }
0x1956   :  { %1115 = vst.msk [vmem:[#allocation4 + $0x2] sm:$0x3] %vm1102_vm8, %v1112_v26  ;;  %1721 = vmatmul.mubr.msk.f32.vlgmr.msra.gmra.mrb[22].mxu1 %vm142_vm1, %v1112_v26 }
0x1959   :  { %v1118_v27 = vpop.permute.xlu0 %1117 }
0x195a   :  { %1121 = vst.msk [vmem:[#allocation4 + $0x6] sm:$0x3] %vm1102_vm8, %v1118_v27 }
0x195b   :  { %1917 = shalt.err (!%p1914_p4)
}
0x195c   :  { %s1918_s2 = scalar_lea.hbm %s2468_s8, 128 }
0x195d   :  { %p1919_p5 = scmp.ne.s32.totalorder %s2468_s8, %s1918_s2  ;;  %p1922_p6 = scmp.lt.u32.totalorder %s1918_s2, %s2468_s8 }
0x195f   :  { %p1924_p7 = pnand %p1922_p6, %p1919_p5 }
0x1961   :  { %1927 = shalt.err (!%p1924_p7)
}
0x1962   :  { %s1963_s10 = smov 2   ;;  %v1648_v32 = vld [vmem:[%s2466_s6 + $0x40] ss:$0 sm:$0xff]  ;;  %s1964_s4 = smov [#allocation2]   ;;  %vm1564_vm12 = vcmask 74752  }
0x1963   :  { %1587 = dma.vmem_to_hbm [thread:$0]  %s1582_s25, 128, %s2468_s8, [#allocation5], %s1954_s29, %s1954_s29, %s1963_s10  }
0x1964   :  { %s1572_s15 = sshll.u32 %s1964_s4, 4  ;;  %s1573_s15 = int_to_ptr.vmem [resolvable:$true] %s1572_s15 }
0x1965   :  { %s1928_s16 = scalar_lea.vmem %s1573_s15, 32  ;;  %p1933_p9 = scmp.lt.s32.totalorder %s1573_s15, %s1573_s15 }
0x1966   :  { %p1929_p8 = scmp.ne.s32.totalorder %s1573_s15, %s1928_s16  ;;  %p1934_p10 = scmp.lt.s32.totalorder %s1928_s16, %s1928_s16 }
0x1968   :  { %p1935_p11 = por %p1934_p10, %p1933_p9 }
0x196a   :  { %p1936_p12 = pnand %p1935_p11, %p1929_p8 }
0x1a29   :  { %v1554_v31 = vpop.f32.mrb[22].mxu1 }
0x1a2a   :  { %v1555_v33 = vadd.f32 %v1554_v31, %v1482_v28  ;;  %v1722_v34 = vpop.f32.mrb[23].mxu1 }
0x1a2c   :  { %v1563_v35 = vadd.f32 %v1648_v32, %v1555_v33 }
0x1a2e   :  { %1565 = vst.msk [vmem:[#allocation2] sm:$0x3] %vm1564_vm12, %v1563_v35 }
0x1a2f   :  { %1939 = shalt.err (!%p1936_p12)
}
0x1a30   :  { %s1940_s17 = scalar_lea.hbm %s2467_s7, 32 }
0x1a31   :  { %p1941_p13 = scmp.ne.s32.totalorder %s2467_s7, %s1940_s17  ;;  %p1944_p0 = scmp.lt.u32.totalorder %s1940_s17, %s2467_s7 }
0x1a33   :  { %p1946_p1 = pnand %p1944_p0, %p1941_p13 }
0x1a35   :  { %1949 = shalt.err (!%p1946_p1)
}
0x1a36   :  { %1575 = dma.vmem_to_hbm [thread:$0]  %s1573_s15, 32, %s2467_s7, [#allocation3]  }
0x1a37   :  { %1950 = dma.done.wait [#allocation3], 32  }
0x1a38   :  { %1951 = vsyncadd [#allocation3], 4294967264 }
0x1a39   :  { %1952 = dma.done.wait [#allocation5], 128  }
0x1a3a   :  { %1953 = vsyncadd [#allocation5], 4294967168 }
0x1a3b   :  { %1594 = vsyncpa [#allocation3], 1 }
0x1a3c   :  { %1595 = vsyncpa [#allocation5], 1 }

</bundles_post_ra>
